<compile_context>
chip_gen: v7x
topology: tpu7x:2x2x1
jax: 0.10.0
libtpu: 0.0.40
codegen_flags: <defaults>
</compile_context>

<pallas_src>
import jax
import jax.numpy as jnp
from jax.experimental import pallas as pl
from jax.experimental.pallas import tpu as pltpu

LANE = 128


def _round_up(n, m):
    return (n + m - 1) // m * m


# --------------------------------------------------------------------------- #
# Kernel: whole 6-layer MLP for one batch tile, all weights VMEM-resident.
# --------------------------------------------------------------------------- #
def autoencoder_kernel(x_ref,
                       w1_ref, b1_ref, w2_ref, b2_ref, w3_ref, b3_ref,
                       w4_ref, b4_ref, w5_ref, b5_ref, w6_ref, b6_ref,
                       out_ref):
    x = x_ref[...]  # f32 (TILE_B, Dp) — kept live for the skip connection

    def layer(h, w_ref, b_ref, leaky):
        # bf16 operands into the MXU, f32 accumulate, f32 elementwise tail.
        y = jnp.dot(h.astype(w_ref.dtype), w_ref[...],
                    preferred_element_type=jnp.float32) + b_ref[...]
        if leaky:
            y = jnp.where(y > 0, y, 0.01 * y)  # LeakyReLU(0.01); Dropout = identity
        return y

    # ---- encoder (BN folded into W/b) ----
    h = layer(x, w1_ref, b1_ref, True)
    h = layer(h, w2_ref, b2_ref, True)
    z = layer(h, w3_ref, b3_ref, False)          # latent
    # ---- decoder ----
    h = layer(z, w4_ref, b4_ref, True)
    h = layer(h, w5_ref, b5_ref, True)
    y = layer(h, w6_ref, b6_ref, False)

    # ---- skip connection ----
    out_ref[...] = (y + x).astype(out_ref.dtype)


# --------------------------------------------------------------------------- #
# Wrapper: batch tiling, lane padding, pallas_call.
# --------------------------------------------------------------------------- #
def autoencoder_forward(x, folded_params, tile_b=128):
    B, D = x.shape
    Dp = folded_params[0].shape[0]            # padded input width (== padded out width)
    tb = min(tile_b, _round_up(B, 8))         # batch tile, multiple of 8 sublanes
    Bp = _round_up(B, tb)

    xp = jnp.zeros((Bp, Dp), jnp.float32).at[:B, :D].set(x.astype(jnp.float32))

    x_spec = pl.BlockSpec((tb, Dp), lambda i: (i, 0))
    # Weights/biases: constant index_map -> DMA'd once, resident across grid steps.
    param_specs = [pl.BlockSpec(p.shape, lambda i: (0, 0)) for p in folded_params]

    out = pl.pallas_call(
        autoencoder_kernel,
        out_shape=jax.ShapeDtypeStruct((Bp, Dp), jnp.float32),
        grid=(Bp // tb,),
        in_specs=[x_spec] + param_specs,
        out_specs=x_spec,
        compiler_params=pltpu.CompilerParams(
            dimension_semantics=("parallel",)),   # megacore sharding on v7x
    )(xp, *folded_params)

    return out[:B, :D].astype(x.dtype)


# --------------------------------------------------------------------------- #
# Parameter construction / folding (JAX glue, one-time).
# --------------------------------------------------------------------------- #
def init_params(key, input_size, hidden_dim, encoding_dim, latent_dim):
    """Synthetic raw parameters matching the PyTorch module's layer shapes.

    Returns a list of (W, b, bn) per Linear layer, W stored as (in, out),
    bn = (gamma, beta, running_mean, running_var) or None.
    """
    dims = [(input_size, hidden_dim), (hidden_dim, encoding_dim),
            (encoding_dim, latent_dim), (latent_dim, encoding_dim),
            (encoding_dim, hidden_dim), (hidden_dim, input_size)]
    has_bn = [True, True, False, True, True, False]

    layers = []
    for i, ((fi, fo), bn) in enumerate(zip(dims, has_bn)):
        kw, kb, kg, kbe, km, kv = jax.random.split(jax.random.fold_in(key, i), 6)
        w = jax.random.normal(kw, (fi, fo), jnp.float32) * 0.1
        b = jax.random.normal(kb, (fo,), jnp.float32) * 0.05
        if bn:
            gamma = 1.0 + 0.1 * jax.random.normal(kg, (fo,), jnp.float32)
            beta = 0.05 * jax.random.normal(kbe, (fo,), jnp.float32)
            rmean = 0.1 * jax.random.normal(km, (fo,), jnp.float32)
            rvar = 1.0 + jax.nn.softplus(jax.random.normal(kv, (fo,), jnp.float32))
            bn_p = (gamma, beta, rmean, rvar)
        else:
            bn_p = None
        layers.append((w, b, bn_p))
    return layers


def prepare_params(layers, lane=LANE, eps=1e-5, weight_dtype=jnp.bfloat16):
    """Fold BN (eval) into W/b, zero-pad to lane width, cast weights to bf16."""
    flat = []
    for w, b, bn in layers:
        if bn is not None:
            gamma, beta, mean, var = bn
            scale = gamma / jnp.sqrt(var + eps)
            shift = beta - mean * scale
            w = w * scale[None, :]
            b = b * scale + shift
        fi, fo = w.shape
        fip, fop = _round_up(fi, lane), _round_up(fo, lane)
        wp = jnp.zeros((fip, fop), jnp.float32).at[:fi, :fo].set(w).astype(weight_dtype)
        bp = jnp.zeros((1, fop), jnp.float32).at[0, :fo].set(b)
        flat += [wp, bp]
    return tuple(flat)


# --------------------------------------------------------------------------- #
# Pure-JAX eval-mode reference (un-folded, un-padded, f32).
# --------------------------------------------------------------------------- #
def reference_forward(x, layers, eps=1e-5):
    acts = [True, True, False, True, True, False]
    h = x
    for (w, b, bn), act in zip(layers, acts):
        h = h @ w + b
        if bn is not None:
            gamma, beta, mean, var = bn
            h = (h - mean) / jnp.sqrt(var + eps) * gamma + beta
        if act:
            h = jnp.where(h > 0, h, 0.01 * h)
        # Dropout = identity in eval mode
    return h + x


if __name__ == "__main__":
    batch = 256
    input_size = 32
    hidden_dim = 64
    encoding_dim = 32
    latent_dim = 16
    # dropout_prob = 0.1 (eval mode -> identity)

    key = jax.random.PRNGKey(0)
    kx, kp = jax.random.split(key)
    x = jax.random.normal(kx, (batch, input_size), jnp.float32)

    layers = init_params(kp, input_size, hidden_dim, encoding_dim, latent_dim)
    folded = prepare_params(layers)

    out = autoencoder_forward(x, folded, tile_b=128)
    out = jax.block_until_ready(out)

    ref = reference_forward(x, layers)
    assert out.shape == (batch, input_size)
    # bf16 weights -> relaxed tolerance vs the f32 reference
    assert jnp.allclose(out, ref, atol=2e-2, rtol=2e-2), (
        "mismatch vs JAX reference, max abs err = "
        f"{float(jnp.max(jnp.abs(out - ref)))}")

    print("KERNEL_OK")
</pallas_src>

<mosaic_0001>
module attributes {stable_mosaic.version = 11 : i64} {
  func.func @autoencoder_kernel(%arg0: i32, %arg1: memref<128x128xf32, #tpu.memory_space<vmem>>, %arg2: memref<128x128xbf16, #tpu.memory_space<vmem>>, %arg3: memref<1x128xf32, #tpu.memory_space<vmem>>, %arg4: memref<128x128xbf16, #tpu.memory_space<vmem>>, %arg5: memref<1x128xf32, #tpu.memory_space<vmem>>, %arg6: memref<128x128xbf16, #tpu.memory_space<vmem>>, %arg7: memref<1x128xf32, #tpu.memory_space<vmem>>, %arg8: memref<128x128xbf16, #tpu.memory_space<vmem>>, %arg9: memref<1x128xf32, #tpu.memory_space<vmem>>, %arg10: memref<128x128xbf16, #tpu.memory_space<vmem>>, %arg11: memref<1x128xf32, #tpu.memory_space<vmem>>, %arg12: memref<128x128xbf16, #tpu.memory_space<vmem>>, %arg13: memref<1x128xf32, #tpu.memory_space<vmem>>, %arg14: memref<128x128xf32, #tpu.memory_space<vmem>>) attributes {dimension_semantics = [#tpu.dimension_semantics<parallel>], iteration_bounds = array<i64: 2>, scalar_prefetch = 0 : i64, scratch_operands = 0 : i64, tpu.core_type = #tpu.core_type<tc>, window_params = [{transform_indices = @transform_0, window_bounds = array<i64: 128, 128>}, {pipeline_mode = #tpu.pipeline_mode<synchronous>, transform_indices = @transform_1, window_bounds = array<i64: 128, 128>}, {pipeline_mode = #tpu.pipeline_mode<synchronous>, transform_indices = @transform_2, window_bounds = array<i64: 1, 128>}, {pipeline_mode = #tpu.pipeline_mode<synchronous>, transform_indices = @transform_3, window_bounds = array<i64: 128, 128>}, {pipeline_mode = #tpu.pipeline_mode<synchronous>, transform_indices = @transform_4, window_bounds = array<i64: 1, 128>}, {pipeline_mode = #tpu.pipeline_mode<synchronous>, transform_indices = @transform_5, window_bounds = array<i64: 128, 128>}, {pipeline_mode = #tpu.pipeline_mode<synchronous>, transform_indices = @transform_6, window_bounds = array<i64: 1, 128>}, {pipeline_mode = #tpu.pipeline_mode<synchronous>, transform_indices = @transform_7, window_bounds = array<i64: 128, 128>}, {pipeline_mode = #tpu.pipeline_mode<synchronous>, transform_indices = @transform_8, window_bounds = array<i64: 1, 128>}, {pipeline_mode = #tpu.pipeline_mode<synchronous>, transform_indices = @transform_9, window_bounds = array<i64: 128, 128>}, {pipeline_mode = #tpu.pipeline_mode<synchronous>, transform_indices = @transform_10, window_bounds = array<i64: 1, 128>}, {pipeline_mode = #tpu.pipeline_mode<synchronous>, transform_indices = @transform_11, window_bounds = array<i64: 128, 128>}, {pipeline_mode = #tpu.pipeline_mode<synchronous>, transform_indices = @transform_12, window_bounds = array<i64: 1, 128>}, {transform_indices = @transform_13, window_bounds = array<i64: 128, 128>}]} {
    %c0 = arith.constant 0 : index
    %c0_0 = arith.constant 0 : index
    %0 = vector.load %arg1[%c0, %c0_0] : memref<128x128xf32, #tpu.memory_space<vmem>>, vector<128x128xf32>
    %1 = arith.truncf %0 : vector<128x128xf32> to vector<128x128xbf16>
    %c0_1 = arith.constant 0 : index
    %c0_2 = arith.constant 0 : index
    %2 = vector.load %arg2[%c0_1, %c0_2] : memref<128x128xbf16, #tpu.memory_space<vmem>>, vector<128x128xbf16>
    %cst = arith.constant dense<0.000000e+00> : vector<128x128xf32>
    %3 = tpu.matmul %1, %2, %cst {dimension_numbers = #tpu.dot_dimension_numbers<[1], [0], [0], [1], [0, 0, 1, 1], [], []>} : vector<128x128xbf16>, vector<128x128xbf16>, vector<128x128xf32> -> vector<128x128xf32>
    %c0_3 = arith.constant 0 : index
    %c0_4 = arith.constant 0 : index
    %4 = vector.load %arg3[%c0_3, %c0_4] : memref<1x128xf32, #tpu.memory_space<vmem>>, vector<1x128xf32>
    %5 = vector.broadcast %4 : vector<1x128xf32> to vector<128x128xf32>
    %6 = arith.addf %3, %5 : vector<128x128xf32>
    %cst_5 = arith.constant 0.000000e+00 : f32
    %7 = vector.broadcast %cst_5 : f32 to vector<128x128xf32>
    %8 = arith.cmpf ogt, %6, %7 : vector<128x128xf32>
    %cst_6 = arith.constant 0.00999999977 : f32
    %9 = vector.broadcast %cst_6 : f32 to vector<128x128xf32>
    %10 = arith.mulf %9, %6 : vector<128x128xf32>
    %11 = arith.select %8, %6, %10 : vector<128x128xi1>, vector<128x128xf32>
    %12 = arith.truncf %11 : vector<128x128xf32> to vector<128x128xbf16>
    %c0_7 = arith.constant 0 : index
    %c0_8 = arith.constant 0 : index
    %13 = vector.load %arg4[%c0_7, %c0_8] : memref<128x128xbf16, #tpu.memory_space<vmem>>, vector<128x128xbf16>
    %cst_9 = arith.constant dense<0.000000e+00> : vector<128x128xf32>
    %14 = tpu.matmul %12, %13, %cst_9 {dimension_numbers = #tpu.dot_dimension_numbers<[1], [0], [0], [1], [0, 0, 1, 1], [], []>} : vector<128x128xbf16>, vector<128x128xbf16>, vector<128x128xf32> -> vector<128x128xf32>
    %c0_10 = arith.constant 0 : index
    %c0_11 = arith.constant 0 : index
    %15 = vector.load %arg5[%c0_10, %c0_11] : memref<1x128xf32, #tpu.memory_space<vmem>>, vector<1x128xf32>
    %16 = vector.broadcast %15 : vector<1x128xf32> to vector<128x128xf32>
    %17 = arith.addf %14, %16 : vector<128x128xf32>
    %cst_12 = arith.constant 0.000000e+00 : f32
    %18 = vector.broadcast %cst_12 : f32 to vector<128x128xf32>
    %19 = arith.cmpf ogt, %17, %18 : vector<128x128xf32>
    %cst_13 = arith.constant 0.00999999977 : f32
    %20 = vector.broadcast %cst_13 : f32 to vector<128x128xf32>
    %21 = arith.mulf %20, %17 : vector<128x128xf32>
    %22 = arith.select %19, %17, %21 : vector<128x128xi1>, vector<128x128xf32>
    %23 = arith.truncf %22 : vector<128x128xf32> to vector<128x128xbf16>
    %c0_14 = arith.constant 0 : index
    %c0_15 = arith.constant 0 : index
    %24 = vector.load %arg6[%c0_14, %c0_15] : memref<128x128xbf16, #tpu.memory_space<vmem>>, vector<128x128xbf16>
    %cst_16 = arith.constant dense<0.000000e+00> : vector<128x128xf32>
    %25 = tpu.matmul %23, %24, %cst_16 {dimension_numbers = #tpu.dot_dimension_numbers<[1], [0], [0], [1], [0, 0, 1, 1], [], []>} : vector<128x128xbf16>, vector<128x128xbf16>, vector<128x128xf32> -> vector<128x128xf32>
    %c0_17 = arith.constant 0 : index
    %c0_18 = arith.constant 0 : index
    %26 = vector.load %arg7[%c0_17, %c0_18] : memref<1x128xf32, #tpu.memory_space<vmem>>, vector<1x128xf32>
    %27 = vector.broadcast %26 : vector<1x128xf32> to vector<128x128xf32>
    %28 = arith.addf %25, %27 : vector<128x128xf32>
    %29 = arith.truncf %28 : vector<128x128xf32> to vector<128x128xbf16>
    %c0_19 = arith.constant 0 : index
    %c0_20 = arith.constant 0 : index
    %30 = vector.load %arg8[%c0_19, %c0_20] : memref<128x128xbf16, #tpu.memory_space<vmem>>, vector<128x128xbf16>
    %cst_21 = arith.constant dense<0.000000e+00> : vector<128x128xf32>
    %31 = tpu.matmul %29, %30, %cst_21 {dimension_numbers = #tpu.dot_dimension_numbers<[1], [0], [0], [1], [0, 0, 1, 1], [], []>} : vector<128x128xbf16>, vector<128x128xbf16>, vector<128x128xf32> -> vector<128x128xf32>
    %c0_22 = arith.constant 0 : index
    %c0_23 = arith.constant 0 : index
    %32 = vector.load %arg9[%c0_22, %c0_23] : memref<1x128xf32, #tpu.memory_space<vmem>>, vector<1x128xf32>
    %33 = vector.broadcast %32 : vector<1x128xf32> to vector<128x128xf32>
    %34 = arith.addf %31, %33 : vector<128x128xf32>
    %cst_24 = arith.constant 0.000000e+00 : f32
    %35 = vector.broadcast %cst_24 : f32 to vector<128x128xf32>
    %36 = arith.cmpf ogt, %34, %35 : vector<128x128xf32>
    %cst_25 = arith.constant 0.00999999977 : f32
    %37 = vector.broadcast %cst_25 : f32 to vector<128x128xf32>
    %38 = arith.mulf %37, %34 : vector<128x128xf32>
    %39 = arith.select %36, %34, %38 : vector<128x128xi1>, vector<128x128xf32>
    %40 = arith.truncf %39 : vector<128x128xf32> to vector<128x128xbf16>
    %c0_26 = arith.constant 0 : index
    %c0_27 = arith.constant 0 : index
    %41 = vector.load %arg10[%c0_26, %c0_27] : memref<128x128xbf16, #tpu.memory_space<vmem>>, vector<128x128xbf16>
    %cst_28 = arith.constant dense<0.000000e+00> : vector<128x128xf32>
    %42 = tpu.matmul %40, %41, %cst_28 {dimension_numbers = #tpu.dot_dimension_numbers<[1], [0], [0], [1], [0, 0, 1, 1], [], []>} : vector<128x128xbf16>, vector<128x128xbf16>, vector<128x128xf32> -> vector<128x128xf32>
    %c0_29 = arith.constant 0 : index
    %c0_30 = arith.constant 0 : index
    %43 = vector.load %arg11[%c0_29, %c0_30] : memref<1x128xf32, #tpu.memory_space<vmem>>, vector<1x128xf32>
    %44 = vector.broadcast %43 : vector<1x128xf32> to vector<128x128xf32>
    %45 = arith.addf %42, %44 : vector<128x128xf32>
    %cst_31 = arith.constant 0.000000e+00 : f32
    %46 = vector.broadcast %cst_31 : f32 to vector<128x128xf32>
    %47 = arith.cmpf ogt, %45, %46 : vector<128x128xf32>
    %cst_32 = arith.constant 0.00999999977 : f32
    %48 = vector.broadcast %cst_32 : f32 to vector<128x128xf32>
    %49 = arith.mulf %48, %45 : vector<128x128xf32>
    %50 = arith.select %47, %45, %49 : vector<128x128xi1>, vector<128x128xf32>
    %51 = arith.truncf %50 : vector<128x128xf32> to vector<128x128xbf16>
    %c0_33 = arith.constant 0 : index
    %c0_34 = arith.constant 0 : index
    %52 = vector.load %arg12[%c0_33, %c0_34] : memref<128x128xbf16, #tpu.memory_space<vmem>>, vector<128x128xbf16>
    %cst_35 = arith.constant dense<0.000000e+00> : vector<128x128xf32>
    %53 = tpu.matmul %51, %52, %cst_35 {dimension_numbers = #tpu.dot_dimension_numbers<[1], [0], [0], [1], [0, 0, 1, 1], [], []>} : vector<128x128xbf16>, vector<128x128xbf16>, vector<128x128xf32> -> vector<128x128xf32>
    %c0_36 = arith.constant 0 : index
    %c0_37 = arith.constant 0 : index
    %54 = vector.load %arg13[%c0_36, %c0_37] : memref<1x128xf32, #tpu.memory_space<vmem>>, vector<1x128xf32>
    %55 = vector.broadcast %54 : vector<1x128xf32> to vector<128x128xf32>
    %56 = arith.addf %53, %55 : vector<128x128xf32>
    %57 = arith.addf %56, %0 : vector<128x128xf32>
    %c0_38 = arith.constant 0 : index
    %c0_39 = arith.constant 0 : index
    %58 = vector.load %arg14[%c0_38, %c0_39] : memref<128x128xf32, #tpu.memory_space<vmem>>, vector<128x128xf32>
    tpu.vector_store %arg14[%c0_38, %c0_39], %57 {strides = array<i32>} : memref<128x128xf32, #tpu.memory_space<vmem>>, vector<128x128xf32>,
    return
  }
  func.func @transform_0(%arg0: i32) -> (i32, i32) {
    %c0_i32 = arith.constant 0 : i32
    %c0_i32_0 = arith.constant 0 : i32
    return %arg0, %c0_i32 : i32, i32
  }
  func.func @transform_1(%arg0: i32) -> (i32, i32) {
    %c0_i32 = arith.constant 0 : i32
    %c0_i32_0 = arith.constant 0 : i32
    %c0_i32_1 = arith.constant 0 : i32
    return %c0_i32, %c0_i32_0 : i32, i32
  }
  func.func @transform_2(%arg0: i32) -> (i32, i32) {
    %c0_i32 = arith.constant 0 : i32
    %c0_i32_0 = arith.constant 0 : i32
    %c0_i32_1 = arith.constant 0 : i32
    return %c0_i32, %c0_i32_0 : i32, i32
  }
  func.func @transform_3(%arg0: i32) -> (i32, i32) {
    %c0_i32 = arith.constant 0 : i32
    %c0_i32_0 = arith.constant 0 : i32
    %c0_i32_1 = arith.constant 0 : i32
    return %c0_i32, %c0_i32_0 : i32, i32
  }
  func.func @transform_4(%arg0: i32) -> (i32, i32) {
    %c0_i32 = arith.constant 0 : i32
    %c0_i32_0 = arith.constant 0 : i32
    %c0_i32_1 = arith.constant 0 : i32
    return %c0_i32, %c0_i32_0 : i32, i32
  }
  func.func @transform_5(%arg0: i32) -> (i32, i32) {
    %c0_i32 = arith.constant 0 : i32
    %c0_i32_0 = arith.constant 0 : i32
    %c0_i32_1 = arith.constant 0 : i32
    return %c0_i32, %c0_i32_0 : i32, i32
  }
  func.func @transform_6(%arg0: i32) -> (i32, i32) {
    %c0_i32 = arith.constant 0 : i32
    %c0_i32_0 = arith.constant 0 : i32
    %c0_i32_1 = arith.constant 0 : i32
    return %c0_i32, %c0_i32_0 : i32, i32
  }
  func.func @transform_7(%arg0: i32) -> (i32, i32) {
    %c0_i32 = arith.constant 0 : i32
    %c0_i32_0 = arith.constant 0 : i32
    %c0_i32_1 = arith.constant 0 : i32
    return %c0_i32, %c0_i32_0 : i32, i32
  }
  func.func @transform_8(%arg0: i32) -> (i32, i32) {
    %c0_i32 = arith.constant 0 : i32
    %c0_i32_0 = arith.constant 0 : i32
    %c0_i32_1 = arith.constant 0 : i32
    return %c0_i32, %c0_i32_0 : i32, i32
  }
  func.func @transform_9(%arg0: i32) -> (i32, i32) {
    %c0_i32 = arith.constant 0 : i32
    %c0_i32_0 = arith.constant 0 : i32
    %c0_i32_1 = arith.constant 0 : i32
    return %c0_i32, %c0_i32_0 : i32, i32
  }
  func.func @transform_10(%arg0: i32) -> (i32, i32) {
    %c0_i32 = arith.constant 0 : i32
    %c0_i32_0 = arith.constant 0 : i32
    %c0_i32_1 = arith.constant 0 : i32
    return %c0_i32, %c0_i32_0 : i32, i32
  }
  func.func @transform_11(%arg0: i32) -> (i32, i32) {
    %c0_i32 = arith.constant 0 : i32
    %c0_i32_0 = arith.constant 0 : i32
    %c0_i32_1 = arith.constant 0 : i32
    return %c0_i32, %c0_i32_0 : i32, i32
  }
  func.func @transform_12(%arg0: i32) -> (i32, i32) {
    %c0_i32 = arith.constant 0 : i32
    %c0_i32_0 = arith.constant 0 : i32
    %c0_i32_1 = arith.constant 0 : i32
    return %c0_i32, %c0_i32_0 : i32, i32
  }
  func.func @transform_13(%arg0: i32) -> (i32, i32) {
    %c0_i32 = arith.constant 0 : i32
    %c0_i32_0 = arith.constant 0 : i32
    return %arg0, %c0_i32 : i32, i32
  }
}

</mosaic_0001>

<bundles_post_ra>
// kernel: tpu_custom_call.1
= control target key start
LH: loop header
LB: loop body
LE: loop exit
PB: predicated region body
PF: predicated region fallthrough
CT: control target
= control target key end

     0   :  { %s3406_s0 = inlined_call_operand.hbm [shape: f32[256,128], index: 0, kind: input, shape index: {}]   ;;  %s3407_s1 = inlined_call_operand.hbm [shape: bf16[128,128], index: 1, kind: input, shape index: {}]   ;;  %s3408_s2 = inlined_call_operand.vmem [shape: f32[1,128], index: 2, kind: input, shape index: {}]   ;;  %s3409_s3 = inlined_call_operand.hbm [shape: bf16[128,128], index: 3, kind: input, shape index: {}]   ;;  %s3410_s4 = inlined_call_operand.vmem [shape: f32[1,128], index: 4, kind: input, shape index: {}]   ;;  %s3411_s5 = inlined_call_operand.hbm [shape: bf16[128,128], index: 5, kind: input, shape index: {}]   ;;  %s3412_s6 = inlined_call_operand.vmem [shape: f32[1,128], index: 6, kind: input, shape index: {}]   ;;  %s3413_s7 = inlined_call_operand.hbm [shape: bf16[128,128], index: 7, kind: input, shape index: {}]   ;;  %s3414_s8 = inlined_call_operand.vmem [shape: f32[1,128], index: 8, kind: input, shape index: {}]   ;;  %s3415_s9 = inlined_call_operand.hbm [shape: bf16[128,128], index: 9, kind: input, shape index: {}]   ;;  %s3416_s10 = inlined_call_operand.vmem [shape: f32[1,128], index: 10, kind: input, shape index: {}]   ;;  %s3417_s11 = inlined_call_operand.hbm [shape: bf16[128,128], index: 11, kind: input, shape index: {}]   ;;  %s3418_s12 = inlined_call_operand.vmem [shape: f32[1,128], index: 12, kind: input, shape index: {}]   ;;  %s3419_s13 = inlined_call_operand.hbm [shape: f32[256,128], index: 13, kind: output, shape index: {}]  }
   0x1   :  { %3424 = sst [smem:[#allocation20_spill]] %s3407_s1 }
   0x2   :  { %3425 = sst [smem:[#allocation21_spill]] %s3412_s6 }
   0x3   :  { %3426 = sst [smem:[#allocation22_spill]] %s3414_s8 }
   0x4   :  { %3427 = sst [smem:[#allocation23_spill]] %s3416_s10 }
   0x5   :  { %3428 = sst [smem:[#allocation24_spill]] %s3418_s12 }
   0x6   :  { %3429 = sst [smem:[#allocation25_spill]] %s3419_s13 }
   0x7   :  { %18 = vsyncpa [#allocation3], 0 }
   0x8   :  { %20 = vsyncpa [#allocation3 + $0x1], 0 }
   0x9   :  { %21 = vsyncpa [#allocation6], 0 }
   0xa   :  { %22 = vsyncpa [#allocation9], 0 }
   0xb   :  { %23 = vsyncpa [#allocation12], 0 }
   0xc   :  { %24 = vsyncpa [#allocation4], 0 }
   0xd   :  { %26 = vsyncpa [#allocation4 + $0x1], 0  ;;  %s2898_s25 = smov 0   ;;  %s2900_s26 = smov 0  }
   0xe   :  { %s2902_s27 = smov 0   ;;  %s2904_s28 = smov 0  }
   0xf LB: > { %s2814_s29 = smov [#allocation5]   ;;  %s2919_s14 = sadd.s32 4294967295, %s2812_s28   ;;  %s2812_s28 = sphi %s2904_s28, %s3458_s28   ;;  %s2808_s27 = sphi %s2902_s27, %s3457_s27   ;;  %s2804_s26 = sphi %s2900_s26, %s3456_s26   ;;  %s2800_s25 = sphi %s2898_s25, %s3455_s25  }
  0x10   : > { %s353_s30 = sshll.u32 %s2814_s29, 4  ;;  %p1990_p0 = scmp.ge.s32.totalorder %s2812_s28, 1  ;;  %s2924_s30 = int_to_ptr.vmem [resolvable:$true] %s353_s30 }
  0x11   : > { %p3421_p1 = scmp.eq.s32.totalorder %s2919_s14, 0  ;;  %p341_p2 = scmp.lt.s32.totalorder %s2812_s28, 3 }
  0x12   : > { %s2815_s16 = smov [#allocation8]   ;;  %s2816_s19 = smov [#allocation11]  }
  0x13   : > { %p2926_p3 = pnand %p1990_p0, %p341_p2  ;;  %s385_s17 = sshll.u32 %s2815_s16, 4  ;;  %s2939_s17 = int_to_ptr.vmem [resolvable:$true] %s385_s17 }
  0x14   : > { %s417_s20 = sshll.u32 %s2816_s19, 4  ;;  %s3432_s1 = sld [smem:[#allocation20_spill]]  ;;  %s2941_s20 = int_to_ptr.vmem [resolvable:$true] %s417_s20 }
  0x15   : > { %s3430_s15 = scalar_select %p2926_p3, 1, 0 }
  0x16   : > { %p2387_p5 = pneg %p2926_p3 }
  0x18   : > { %p2935_p6 = pnand %p2387_p5, %p3421_p1 }
  0x1a   : > { %s2536_s23 = scalar_lea.hbm %s3432_s1, 1024  ;;  %p2951_p8 = pneg %p2935_p6 }
  0x1b   : > { %p2537_p7 = scmp.ne.s32.totalorder %s3432_s1, %s2536_s23  ;;  %p2543_p11 = scmp.lt.u32.totalorder %s2536_s23, %s3432_s1 }
  0x1d   : > { %p2539_p9 = pnand %p2951_p8, %p2537_p7 }
  0x1f   : > { %p2540_p10 = pneg %p2539_p9 }
  0x21   : > { %p2545_p12 = pnand %p2543_p11, %p2540_p10 }
  0x23   : > { %2548 = shalt.err (!%p2545_p12)
}
  0x24   : > { %s2549_s21 = scalar_lea.vmem %s2924_s30, 1024  ;;  %p2557_p5 = scmp.lt.s32.totalorder %s2924_s30, %s2924_s30 }
  0x25   : > { %p2550_p13 = scmp.ne.s32.totalorder %s2924_s30, %s2549_s21  ;;  %p2558_p4 = scmp.lt.s32.totalorder %s2549_s21, %s2549_s21 }
  0x27   : > { %p2552_p0 = pnand %p2550_p13, %p2951_p8  ;;  %p2559_p7 = por %p2558_p4, %p2557_p5 }
  0x29   : > { %p2553_p2 = pneg %p2552_p0 }
  0x2b   : > { %p2560_p9 = pnand %p2559_p7, %p2553_p2 }
  0x2d   : > { %2563 = shalt.err (!%p2560_p9)
}
  0x2e   : > { %s2817_s22 = smov 64   ;;  %s2818_s13 = smov 4  }
  0x2f   : > { %2390 = dma.hbm_to_vmem [thread:$0]  (!%p2935_p6), %s3432_s1, 1024, %s2924_s30, [#allocation6], %s2817_s22, %s2817_s22, %s2818_s13  }
  0x30   : > { %s2564_s21 = scalar_lea.hbm %s3411_s5, 1024 }
  0x31   : > { %p2565_p4 = scmp.ne.s32.totalorder %s3411_s5, %s2564_s21  ;;  %p2571_p12 = scmp.lt.u32.totalorder %s2564_s21, %s3411_s5 }
  0x33   : > { %p2567_p10 = pnand %p2565_p4, %p2951_p8 }
  0x35   : > { %p2568_p11 = pneg %p2567_p10 }
  0x37   : > { %p2573_p13 = pnand %p2571_p12, %p2568_p11 }
  0x39   : > { %2576 = shalt.err (!%p2573_p13)
}
  0x3a   : > { %s2577_s30 = scalar_lea.vmem %s2939_s17, 1024  ;;  %p2585_p7 = scmp.lt.s32.totalorder %s2939_s17, %s2939_s17 }
  0x3b   : > { %p2578_p0 = scmp.ne.s32.totalorder %s2939_s17, %s2577_s30  ;;  %p2586_p9 = scmp.lt.s32.totalorder %s2577_s30, %s2577_s30 }
  0x3d   : > { %p2580_p2 = pnand %p2578_p0, %p2951_p8  ;;  %p2587_p4 = por %p2586_p9, %p2585_p7 }
  0x3f   : > { %p2581_p5 = pneg %p2580_p2 }
  0x41   : > { %p2588_p10 = pnand %p2587_p4, %p2581_p5 }
  0x43   : > { %2591 = shalt.err (!%p2588_p10)
}
  0x44   : > { %2396 = dma.hbm_to_vmem [thread:$0]  (!%p2935_p6), %s3411_s5, 1024, %s2939_s17, [#allocation9], %s2817_s22, %s2817_s22, %s2818_s13  }
  0x45   : > { %s2592_s23 = scalar_lea.hbm %s3415_s9, 1024 }
  0x46   : > { %p2593_p11 = scmp.ne.s32.totalorder %s3415_s9, %s2592_s23  ;;  %p2599_p0 = scmp.lt.u32.totalorder %s2592_s23, %s3415_s9 }
  0x48   : > { %p2595_p12 = pnand %p2593_p11, %p2951_p8 }
  0x4a   : > { %p2596_p13 = pneg %p2595_p12 }
  0x4c   : > { %p2601_p2 = pnand %p2599_p0, %p2596_p13 }
  0x4e   : > { %2604 = shalt.err (!%p2601_p2)
}
  0x4f   : > { %s2605_s17 = scalar_lea.vmem %s2941_s20, 1024  ;;  %p2613_p4 = scmp.lt.s32.totalorder %s2941_s20, %s2941_s20 }
  0x50   : > { %p2606_p5 = scmp.ne.s32.totalorder %s2941_s20, %s2605_s17  ;;  %p2614_p10 = scmp.lt.s32.totalorder %s2605_s17, %s2605_s17 }
  0x52   : > { %p2608_p7 = pnand %p2606_p5, %p2951_p8  ;;  %p2615_p11 = por %p2614_p10, %p2613_p4 }
  0x54   : > { %p2609_p9 = pneg %p2608_p7 }
  0x56   : > { %p2616_p12 = pnand %p2615_p11, %p2609_p9 }
  0x58   : > { %2619 = shalt.err (!%p2616_p12)
}
  0x59   : > { %2402 = dma.hbm_to_vmem [thread:$0]  (!%p2935_p6), %s3415_s9, 1024, %s2941_s20, [#allocation12], %s2817_s22, %s2817_s22, %s2818_s13  }
  0x5a   : > { %s2819_s8 = smov [#allocation7]   ;;  %s2820_s12 = smov [#allocation10]  }
  0x5b   : > { %s369_s10 = sshll.u32 %s2819_s8, 4  ;;  %s401_s23 = sshll.u32 %s2820_s12, 4  ;;  %s370_s10 = int_to_ptr.vmem [resolvable:$true] %s369_s10  ;;  %s402_s23 = int_to_ptr.vmem [resolvable:$true] %s401_s23 }
  0x5c   : > { %s2620_s19 = scalar_lea.hbm %s3409_s3, 1024 }
  0x5d   : > { %p2621_p13 = scmp.ne.s32.totalorder %s3409_s3, %s2620_s19  ;;  %p2627_p5 = scmp.lt.u32.totalorder %s2620_s19, %s3409_s3 }
  0x5f   : > { %p2623_p0 = pnand %p2621_p13, %p2951_p8 }
  0x61   : > { %p2624_p2 = pneg %p2623_p0 }
  0x63   : > { %p2629_p7 = pnand %p2627_p5, %p2624_p2 }
  0x65   : > { %2632 = shalt.err (!%p2629_p7)
}
  0x66   : > { %s2633_s20 = scalar_lea.vmem %s370_s10, 1024  ;;  %p2641_p11 = scmp.lt.s32.totalorder %s370_s10, %s370_s10 }
  0x67   : > { %p2634_p9 = scmp.ne.s32.totalorder %s370_s10, %s2633_s20  ;;  %p2642_p12 = scmp.lt.s32.totalorder %s2633_s20, %s2633_s20 }
  0x69   : > { %p2636_p4 = pnand %p2634_p9, %p2951_p8  ;;  %p2643_p1 = por %p2642_p12, %p2641_p11 }
  0x6b   : > { %p2637_p10 = pneg %p2636_p4 }
  0x6d   : > { %p2644_p3 = pnand %p2643_p1, %p2637_p10 }
  0x6f   : > { %2647 = shalt.err (!%p2644_p3)
}
  0x70   : > { %2393 = dma.hbm_to_vmem [thread:$0]  (!%p2935_p6), %s3409_s3, 1024, %s370_s10, [#allocation6], %s2817_s22, %s2817_s22, %s2818_s13  }
  0x71   : > { %s2648_s24 = scalar_lea.hbm %s3413_s7, 1024 }
  0x72   : > { %p2649_p1 = scmp.ne.s32.totalorder %s3413_s7, %s2648_s24  ;;  %p2655_p0 = scmp.lt.u32.totalorder %s2648_s24, %s3413_s7 }
  0x74   : > { %p2651_p3 = pnand %p2649_p1, %p2951_p8 }
  0x76   : > { %p2652_p13 = pneg %p2651_p3 }
  0x78   : > { %p2657_p2 = pnand %p2655_p0, %p2652_p13 }
  0x7a   : > { %2660 = shalt.err (!%p2657_p2)
}
  0x7b   : > { %s2661_s30 = scalar_lea.vmem %s402_s23, 1024  ;;  %p2669_p4 = scmp.lt.s32.totalorder %s402_s23, %s402_s23 }
  0x7c   : > { %p2662_p5 = scmp.ne.s32.totalorder %s402_s23, %s2661_s30  ;;  %p2670_p10 = scmp.lt.s32.totalorder %s2661_s30, %s2661_s30 }
  0x7e   : > { %p2664_p7 = pnand %p2662_p5, %p2951_p8  ;;  %p2671_p11 = por %p2670_p10, %p2669_p4 }
  0x80   : > { %p2665_p9 = pneg %p2664_p7 }
  0x82   : > { %p2672_p12 = pnand %p2671_p11, %p2665_p9 }
  0x84   : > { %2675 = shalt.err (!%p2672_p12)
}
  0x85   : > { %2399 = dma.hbm_to_vmem [thread:$0]  (!%p2935_p6), %s3413_s7, 1024, %s402_s23, [#allocation9], %s2817_s22, %s2817_s22, %s2818_s13  }
  0x86   : > { %s2821_s1 = smov [#allocation13]   ;;  %s2676_s24 = scalar_lea.hbm %s3417_s11, 1024 }
  0x87   : > { %s433_s6 = sshll.u32 %s2821_s1, 4  ;;  %p2677_p1 = scmp.ne.s32.totalorder %s3417_s11, %s2676_s24  ;;  %s434_s6 = int_to_ptr.vmem [resolvable:$true] %s433_s6 }
  0x88   : > { %p2683_p0 = scmp.lt.u32.totalorder %s2676_s24, %s3417_s11 }
  0x89   : > { %p2679_p3 = pnand %p2677_p1, %p2951_p8 }
  0x8b   : > { %p2680_p13 = pneg %p2679_p3 }
  0x8d   : > { %p2685_p2 = pnand %p2683_p0, %p2680_p13 }
  0x8f   : > { %2688 = shalt.err (!%p2685_p2)
}
  0x90   : > { %s2689_s23 = scalar_lea.vmem %s434_s6, 1024  ;;  %p2697_p4 = scmp.lt.s32.totalorder %s434_s6, %s434_s6 }
  0x91   : > { %p2690_p5 = scmp.ne.s32.totalorder %s434_s6, %s2689_s23  ;;  %p2698_p10 = scmp.lt.s32.totalorder %s2689_s23, %s2689_s23 }
  0x93   : > { %p2692_p7 = pnand %p2690_p5, %p2951_p8  ;;  %p2699_p11 = por %p2698_p10, %p2697_p4 }
  0x95   : > { %p2693_p9 = pneg %p2692_p7 }
  0x97   : > { %p2700_p12 = pnand %p2699_p11, %p2693_p9 }
  0x99   : > { %2703 = shalt.err (!%p2700_p12)
}
  0x9a   : > { %2405 = dma.hbm_to_vmem [thread:$0]  (!%p2935_p6), %s3417_s11, 1024, %s434_s6, [#allocation12], %s2817_s22, %s2817_s22, %s2818_s13  }
  0x9b   : > { %s1989_s18 = sadd.s32 4294967294, %s2812_s28   ;;  %s3092_s16 = sadd.s32 1, %s2812_s28  }
  0x9c   : > { %s36_s20 = ssub.s32 %s2812_s28, %s3092_s16  ;;  %s39_s1 = sadd.s32 1, %s2808_s27 }
  0x9d   : > { %p37_p8 = scmp.eq.s32.totalorder %s36_s20, 0  ;;  %p46_p1 = scmp.ne.s32.totalorder %s2808_s27, %s2804_s26 }
  0x9e   : > { %p47_p3 = scmp.eq.s32.totalorder %s2812_s28, 0  ;;  %p52_p13 = scmp.ne.s32.totalorder %s2804_s26, %s2800_s25 }
  0x9f   : > { %s3103_s8 = scalar_select %p37_p8, %s2808_s27, %s39_s1  }
  0xa0   : > { %p3105_p0 = por %p47_p3, %p46_p1  ;;  %p3435_p2 = scmp.eq.s32.totalorder %s2919_s14, 0 }
  0xa1   : > { %p328_p5 = scmp.eq.s32.totalorder %s2919_s14, 1  ;;  %p334_p7 = scmp.eq.s32.totalorder %s1989_s18, 1 }
  0xa2   : > { %p3111_p6 = por %p3435_p2, %p52_p13  ;;  %p2420_p9 = scmp.lt.s32.totalorder %s2812_s28, 2 }
  0xa3   : > { %s450_s13 = sand.u32 1, %s2808_s27   ;;  %p3118_p4 = por %p328_p5, %p46_p1 }
  0xa4   : > { %p3122_p10 = por %p334_p7, %p52_p13  ;;  %s1998_s29 = sshll.u32 %s450_s13, 7 }
  0xa5   : > { %s3437_s6 = scalar_select %p3118_p4, 1, 0 }
  0xa6   : > { %s3438_s24 = scalar_select %p3122_p10, 1, 0 }
  0xa7   : > { %s2069_s19 = sshll.u32 %s2812_s28, 11  ;;  %s454_s30 = scalar_lea.vmem [#allocation2], %s1998_s29 }
  0xa8   : > { %s3130_s23 = scalar_lea.hbm %s3406_s0, %s2069_s19  ;;  %s461_s10 = sshll.u32 %s454_s30, 4  ;;  %s3132_s10 = int_to_ptr.vmem [resolvable:$true] %s461_s10 }
  0xa9   : > { %p3136_p11 = pnand %p2420_p9, %p3105_p0  ;;  %s3140_s20 = scalar_lea.sflag [#allocation3], %s450_s13 }
  0xaa   : > { %s2704_s1 = scalar_lea.hbm %s3130_s23, 2048  ;;  %s2709_s12 = scalar_lea.hbm %s3406_s0, 4096 }
  0xab   : > { %p2705_p12 = scmp.ne.s32.totalorder %s3130_s23, %s2704_s1  ;;  %p2706_p8 = pneg %p3136_p11 }
  0xac   : > { %p2710_p13 = scmp.lt.u32.totalorder %s3130_s23, %s3406_s0  ;;  %p2711_p0 = scmp.lt.u32.totalorder %s2709_s12, %s2704_s1 }
  0xad   : > { %p2707_p1 = pnand %p2706_p8, %p2705_p12  ;;  %p2713_p5 = scmp.lt.u32.totalorder %s2704_s1, %s3130_s23 }
  0xae   : > { %p2712_p2 = por %p2711_p0, %p2710_p13 }
  0xaf   : > { %p2708_p3 = pneg %p2707_p1 }
  0xb0   : > { %p2714_p7 = por %p2713_p5, %p2712_p2 }
  0xb2   : > { %p2715_p9 = pnand %p2714_p7, %p2708_p3 }
  0xb4   : > { %2718 = shalt.err (!%p2715_p9)
}
  0xb5   : > { %s2719_s13 = scalar_lea.vmem %s3132_s10, 2048  ;;  %s2822_s30 = smov [#allocation2]  }
  0xb6   : > { %p2720_p12 = scmp.ne.s32.totalorder %s3132_s10, %s2719_s13  ;;  %s2724_s29 = sshll.u32 %s2822_s30, 4  ;;  %s2725_s29 = int_to_ptr.vmem [resolvable:$false] %s2724_s29 }
  0xb7   : > { %s2726_s19 = scalar_lea.vmem %s2725_s29, 4096  ;;  %p2727_p4 = scmp.lt.s32.totalorder %s3132_s10, %s2725_s29 }
  0xb8   : > { %p2722_p1 = pnand %p2720_p12, %p2706_p8  ;;  %p2728_p13 = scmp.lt.s32.totalorder %s2726_s19, %s2719_s13 }
  0xba   : > { %p2723_p10 = pneg %p2722_p1  ;;  %p2729_p0 = por %p2728_p13, %p2727_p4 }
  0xbc   : > { %p2730_p2 = pnand %p2729_p0, %p2723_p10 }
  0xbe   : > { %2733 = shalt.err (!%p2730_p2)
}
  0xbf   : > { %s2823_s1 = smov 128   ;;  %s2824_s12 = smov 8  }
  0xc0   : > { %2409 = dma.hbm_to_vmem [thread:$0]  (!%p3136_p11), %s3130_s23, 2048, %s3132_s10, %s3140_s20, %s2823_s1, %s2823_s1, %s2824_s12  }
  0xc1   : > { %p3440_p8 = scmp.ne.s32.totalorder %s3430_s15, 0 }
  0xc2   : > { %s3171_s21 = sand.u32 (!%p3440_p8), 1, %s2804_s26  }
  0xc3   : > { %473 = sbr.rel (%p3440_p8) target bundleno = 1616 (0x650), region = 72  ;;  %s2002_s17 = sshll.u32 (!%p3440_p8), %s3171_s21, 7 }
  0xc4   : > { %s476_s13 = scalar_lea.sflag (!%p3440_p8), [#allocation3], %s3171_s21  ;;  %s3177_s30 = scalar_lea.vmem (!%p3440_p8), [#allocation2], %s2002_s17 }
  0xca   : > { %2779 = dma.done.wait (%p3111_p6), %s476_s13, 2048  }
  0xcb   : > { %2781 = vsyncadd (%p3111_p6), %s476_s13, 4294965248  ;;  %p3441_p4 = scmp.eq.s32.totalorder %s2919_s14, 0 }
  0xcd   : > { %2783 = dma.done.wait (%p3441_p4), [#allocation6], 2048   ;;  %p3442_p10 = pmov %p3441_p4 }
  0xce   : > { %p3443_p11 = pmov %p3441_p4 }
  0xcf   : > { %2785 = vsyncadd (%p3442_p10), [#allocation6], 4294965248 }
  0xd0   : > { %2787 = dma.done.wait (%p3443_p11), [#allocation9], 2048   ;;  %p3444_p3 = pmov %p3441_p4 }
  0xd2   : > { %2789 = vsyncadd (%p3444_p3), [#allocation9], 4294965248  ;;  %p3445_p5 = pmov %p3444_p3 }
  0xd3   : > { %p3446_p7 = pmov %p3444_p3 }
  0xd4   : > { %2791 = dma.done.wait (%p3445_p5), [#allocation12], 2048  }
  0xd5   : > { %2793 = vsyncadd (%p3446_p7), [#allocation12], 4294965248  ;;  %v2472_v0 = vld [vmem:[#allocation5] sm:$0xff]   ;;  %v2473_v1 = vld [vmem:[#allocation5 + $0x8] sm:$0xff]   ;;  %s3447_s29 = sld [smem:[#allocation21_spill]]  ;;  %s3448_s12 = sld [smem:[#allocation22_spill]] }
  0xd6   : > { %2167 = vmatprep.subr.bf16.mxu0 %v2472_v0  ;;  %v2474_v2 = vld [vmem:[#allocation5 + $0x10] sm:$0xff]   ;;  %v2475_v3 = vld [vmem:[#allocation5 + $0x18] sm:$0xff]   ;;  %v549_v4 = vld [vmem:[%s3177_s30] sm:$0xff]  ;;  %s3449_s22 = sld [smem:[#allocation23_spill]]  ;;  %s3450_s18 = sld [smem:[#allocation24_spill]] }
  0xd7   : > { %2168 = vmatpush3.bf16.msra.mxu0 %v2472_v0  ;;  %v550_v5 = vld [vmem:[%s3177_s30 + $0x8] sm:$0xff]  ;;  %v2476_v7 = vld [vmem:[#allocation5 + $0x20] sm:$0xff]   ;;  %v2478_v11 = vld [vmem:[#allocation5 + $0x30] sm:$0xff]   ;;  %s3311_s20 = scalar_lea.vmem [#allocation14], %s2002_s17  ;;  %s2070_s17 = sshll.u32 %s2919_s14, 11 }
  0xd8   : > { %2169 = vmatprep.subr.bf16.mxu0 %v2473_v1  ;;  %v565_v6 = vpack.c.bf16 %v550_v5, %v549_v4  ;;  %v2480_v8 = vld [vmem:[#allocation7] sm:$0xff]   ;;  %v2481_v9 = vld [vmem:[#allocation7 + $0x8] sm:$0xff]   ;;  %v2482_v12 = vld [vmem:[#allocation7 + $0x10] sm:$0xff]   ;;  %s3451_s14 = sld [smem:[#allocation25_spill]]  ;;  %s1846_s13 = scalar_lea.sflag [#allocation4], %s3171_s21 }
  0xd9   : > { %v2477_v10 = vld [vmem:[#allocation5 + $0x28] sm:$0xff]   ;;  %2199 = vmatprep.subr.bf16.mxu1 %v2480_v8  ;;  %v2483_v13 = vld [vmem:[#allocation7 + $0x18] sm:$0xff]   ;;  %v2484_v15 = vld [vmem:[#allocation7 + $0x20] sm:$0xff]   ;;  %p3452_p9 = scmp.ne.s32.totalorder %s3437_s6, 0 }
  0xda   : > { %2183 = vmatprep.mubr.bf16.mxu0 %v565_v6  ;;  %2200 = vmatpush3.bf16.msra.mxu1 %v2480_v8  ;;  %v2479_v14 = vld [vmem:[#allocation5 + $0x38] sm:$0xff]   ;;  %v551_v16 = vld [vmem:[%s3177_s30 + $0x10] sm:$0xff]  ;;  %v553_v18 = vld [vmem:[%s3177_s30 + $0x20] sm:$0xff] }
  0xdb   : > { %2170 = vmatpush3.bf16.msra.mxu0 %v2473_v1  ;;  %2201 = vmatprep.subr.bf16.mxu1 %v2481_v9  ;;  %v552_v17 = vld [vmem:[%s3177_s30 + $0x18] sm:$0xff]  ;;  %v554_v19 = vld [vmem:[%s3177_s30 + $0x28] sm:$0xff]  ;;  %v555_v22 = vld [vmem:[%s3177_s30 + $0x30] sm:$0xff] }
  0xdc   : > { %2171 = vmatprep.subr.bf16.mxu0 %v2474_v2  ;;  %v566_v20 = vpack.c.bf16 %v552_v17, %v551_v16  ;;  %v567_v21 = vpack.c.bf16 %v554_v19, %v553_v18  ;;  %v556_v23 = vld [vmem:[%s3177_s30 + $0x38] sm:$0xff]  ;;  %v557_v24 = vld [vmem:[%s3177_s30 + $0x40] sm:$0xff]  ;;  %v558_v25 = vld [vmem:[%s3177_s30 + $0x48] sm:$0xff] }
  0xdd   : > { %v568_v26 = vpack.c.bf16 %v556_v23, %v555_v22  ;;  %v569_v27 = vpack.c.bf16 %v558_v25, %v557_v24  ;;  %v559_v28 = vld [vmem:[%s3177_s30 + $0x50] sm:$0xff]  ;;  %v560_v29 = vld [vmem:[%s3177_s30 + $0x58] sm:$0xff]  ;;  %v561_v30 = vld [vmem:[%s3177_s30 + $0x60] sm:$0xff] }
  0xde   : > { %2202 = vmatpush3.bf16.msra.mxu1 %v2481_v9  ;;  %v562_v31 = vld [vmem:[%s3177_s30 + $0x68] sm:$0xff]  ;;  %v570_v32 = vpack.c.bf16 %v560_v29, %v559_v28  ;;  %v563_v34 = vld [vmem:[%s3177_s30 + $0x70] sm:$0xff]  ;;  %v564_v35 = vld [vmem:[%s3177_s30 + $0x78] sm:$0xff] }
  0xdf   : > { %2172 = vmatpush3.bf16.msra.mxu0 %v2474_v2  ;;  %2203 = vmatprep.subr.bf16.mxu1 %v2482_v12  ;;  %v571_v33 = vpack.c.bf16 %v562_v31, %v561_v30  ;;  %v572_v36 = vpack.c.bf16 %v564_v35, %v563_v34  ;;  %v2485_v37 = vld [vmem:[#allocation7 + $0x28] sm:$0xff]   ;;  %v2486_v38 = vld [vmem:[#allocation7 + $0x30] sm:$0xff]   ;;  %v2487_v39 = vld [vmem:[#allocation7 + $0x38] sm:$0xff]  }
  0xe0   : > { %2173 = vmatprep.subr.bf16.mxu0 %v2475_v3  ;;  %v2488_v40 = vld [vmem:[#allocation8] sm:$0xff]   ;;  %v2489_v41 = vld [vmem:[#allocation8 + $0x8] sm:$0xff]   ;;  %v2490_v42 = vld [vmem:[#allocation8 + $0x10] sm:$0xff]  }
  0xe1   : > { %v2491_v43 = vld [vmem:[#allocation8 + $0x18] sm:$0xff]   ;;  %v2492_v44 = vld [vmem:[#allocation8 + $0x20] sm:$0xff]   ;;  %v2493_v45 = vld [vmem:[#allocation8 + $0x28] sm:$0xff]  }
  0xe2   : > { %2204 = vmatpush3.bf16.msra.mxu1 %v2482_v12  ;;  %v3214_v46 = vld [vmem:[%s3408_s2] ss:$0 sm:$0xff] }
  0xe3   : > { %2174 = vmatpush3.bf16.msra.mxu0 %v2475_v3  ;;  %2205 = vmatprep.subr.bf16.mxu1 %v2483_v13 }
  0xe4   : > { %2175 = vmatprep.subr.bf16.mxu0 %v2476_v7 }
  0xe6   : > { %2206 = vmatpush3.bf16.msra.mxu1 %v2483_v13 }
  0xe7   : > { %2176 = vmatpush3.bf16.msra.mxu0 %v2476_v7  ;;  %2207 = vmatprep.subr.bf16.mxu1 %v2484_v15 }
  0xe8   : > { %2177 = vmatprep.subr.bf16.mxu0 %v2477_v10 }
  0xea   : > { %2208 = vmatpush3.bf16.msra.mxu1 %v2484_v15 }
  0xeb   : > { %2178 = vmatpush3.bf16.msra.mxu0 %v2477_v10  ;;  %2209 = vmatprep.subr.bf16.mxu1 %v2485_v37 }
  0xec   : > { %2179 = vmatprep.subr.bf16.mxu0 %v2478_v11 }
  0xee   : > { %2210 = vmatpush3.bf16.msra.mxu1 %v2485_v37 }
  0xef   : > { %2180 = vmatpush3.bf16.msra.mxu0 %v2478_v11  ;;  %2211 = vmatprep.subr.bf16.mxu1 %v2486_v38 }
  0xf0   : > { %2181 = vmatprep.subr.bf16.mxu0 %v2479_v14 }
  0xf2   : > { %2212 = vmatpush3.bf16.msra.mxu1 %v2486_v38 }
  0xf3   : > { %2182 = vmatpush3.bf16.msra.mxu0 %v2479_v14  ;;  %2213 = vmatprep.subr.bf16.mxu1 %v2487_v39 }
  0xf4   : > { %2231 = vmatprep.subr.bf16.mxu0 %v2488_v40 }
  0xf6   : > { %2184 = vmatmul.mubr.bf16.vlgmr.msra.gmra.mrb[0].mxu0 %v566_v20  ;;  %2214 = vmatpush3.bf16.msra.mxu1 %v2487_v39 }
  0xf7   : > { %2187 = vmatprep.mubr.bf16.mxu0 %v567_v21  ;;  %2232 = vmatpush3.bf16.msra.mxu0 %v2488_v40 }
  0xf8   : > { %2233 = vmatprep.subr.bf16.mxu0 %v2489_v41 }
  0xfb   : > { %2234 = vmatpush3.bf16.msra.mxu0 %v2489_v41 }
  0xfc   : > { %2235 = vmatprep.subr.bf16.mxu0 %v2490_v42 }
  0xfe   : > { %2188 = vmatmul.mubr.bf16.gmra.mrb[4].mxu0 %v568_v26 }
  0xff   : > { %2191 = vmatprep.mubr.bf16.mxu0 %v569_v27  ;;  %2236 = vmatpush3.bf16.msra.mxu0 %v2490_v42 }
 0x100   : > { %2237 = vmatprep.subr.bf16.mxu0 %v2491_v43 }
 0x103   : > { %2238 = vmatpush3.bf16.msra.mxu0 %v2491_v43 }
 0x104   : > { %2239 = vmatprep.subr.bf16.mxu0 %v2492_v44 }
 0x106   : > { %2192 = vmatmul.mubr.bf16.gmra.mrb[8].mxu0 %v570_v32 }
 0x107   : > { %2195 = vmatprep.mubr.bf16.mxu0 %v571_v33  ;;  %2240 = vmatpush3.bf16.msra.mxu0 %v2492_v44 }
 0x108   : > { %2241 = vmatprep.subr.bf16.mxu0 %v2493_v45 }
 0x10b   : > { %2242 = vmatpush3.bf16.msra.mxu0 %v2493_v45 }
 0x10e   : > { %2196 = vmatmul.mubr.bf16.gmra.mrb[12].mxu0 %v572_v36 }
 0x1c9   : > { %v2185_v47 = vpop.f32.mrb[0].mxu0 }
 0x1ca   : > { %v687_v48 = vadd.f32 %v2185_v47, %v3214_v46  ;;  %v678_v49 = vpop.f32.mrb[1].mxu0 }
 0x1cb   : > { %v679_v50 = vadd.f32 %v3214_v46, %v678_v49  ;;  %v2186_v51 = vpop.f32.mrb[2].mxu0 }
 0x1cc   : > { %v759_v52 = vmul.f32 0.01, %v687_v48  ;;  %v690_v53 = vadd.f32 %v2186_v51, %v3214_v46  ;;  %v681_v54 = vpop.f32.mrb[3].mxu0  ;;  %vm743_vm0 = vcmp.gt.f32.partialorder %v687_v48, 0.0 }
 0x1cd   : > { %v757_v55 = vmul.f32 0.01, %v679_v50  ;;  %v682_v56 = vadd.f32 %v3214_v46, %v681_v54  ;;  %vm741_vm2 = vcmp.gt.f32.partialorder %v679_v50, 0.0 }
 0x1ce   : > { %vm744_vm1 = vcmp.gt.f32.partialorder %v690_v53, 0.0  ;;  %v760_v57 = vmul.f32 0.01, %v690_v53  ;;  %v775_v59 = vsel %vm743_vm0, %v687_v48, %v759_v52 }
 0x1cf   : > { %v758_v58 = vmul.f32 0.01, %v682_v56  ;;  %vm742_vm3 = vcmp.gt.f32.partialorder %v682_v56, 0.0  ;;  %v773_v62 = vsel %vm741_vm2, %v679_v50, %v757_v55 }
 0x1d0   : > { %v776_v60 = vsel %vm744_vm1, %v690_v53, %v760_v57  ;;  %v2495_v57 = vld [vmem:[#allocation8 + $0x38] sm:$0xff]  }
 0x1d1   : > { %v2189_v61 = vpop.f32.mrb[4].mxu0  ;;  %v774_v63 = vsel %vm742_vm3, %v682_v56, %v758_v58  ;;  %v790_v0 = vpack.c.bf16 %v776_v60, %v775_v59  ;;  %v2494_v56 = vld [vmem:[#allocation8 + $0x30] sm:$0xff]   ;;  %v2497_v58 = vld [vmem:[#allocation10 + $0x8] sm:$0xff]   ;;  %v2499_v60 = vld [vmem:[#allocation10 + $0x18] sm:$0xff]  }
 0x1d2   : > { %v703_v1 = vadd.f32 %v2189_v61, %v3214_v46  ;;  %v694_v2 = vpop.f32.mrb[5].mxu0  ;;  %v789_v3 = vpack.c.bf16 %v774_v63, %v773_v62  ;;  %2243 = vmatprep.subr.bf16.mxu0 %v2494_v56  ;;  %v2498_v59 = vld [vmem:[#allocation10 + $0x10] sm:$0xff]   ;;  %v2500_v61 = vld [vmem:[#allocation10 + $0x20] sm:$0xff]   ;;  %v2501_v62 = vld [vmem:[#allocation10 + $0x28] sm:$0xff]  }
 0x1d3   : > { %v695_v4 = vadd.f32 %v3214_v46, %v694_v2  ;;  %v2190_v5 = vpop.f32.mrb[6].mxu0  ;;  %2244 = vmatpush3.bf16.msra.mxu0 %v2494_v56  ;;  %v3235_v63 = vld [vmem:[%s3410_s4] ss:$0 sm:$0xff] }
 0x1d4   : > { %v763_v6 = vmul.f32 0.01, %v703_v1  ;;  %v706_v7 = vadd.f32 %v2190_v5, %v3214_v46  ;;  %v697_v8 = vpop.f32.mrb[7].mxu0  ;;  %2215 = vmatprep.mubr.bf16.mxu1 %v789_v3  ;;  %vm747_vm4 = vcmp.gt.f32.partialorder %v703_v1, 0.0  ;;  %2245 = vmatprep.subr.bf16.mxu0 %v2495_v57 }
 0x1d5   : > { %v761_v9 = vmul.f32 0.01, %v695_v4  ;;  %v698_v10 = vadd.f32 %v3214_v46, %v697_v8  ;;  %2216 = vmatmul.mubr.bf16.vlgmr.msra.gmra.mrb[0].mxu1 %v790_v0  ;;  %vm745_vm5 = vcmp.gt.f32.partialorder %v695_v4, 0.0 }
 0x1d6   : > { %vm748_vm6 = vcmp.gt.f32.partialorder %v706_v7, 0.0  ;;  %v764_v11 = vmul.f32 0.01, %v706_v7  ;;  %v779_v13 = vsel %vm747_vm4, %v703_v1, %v763_v6 }
 0x1d7   : > { %vm746_vm7 = vcmp.gt.f32.partialorder %v698_v10, 0.0  ;;  %v762_v12 = vmul.f32 0.01, %v698_v10  ;;  %v777_v16 = vsel %vm745_vm5, %v695_v4, %v761_v9  ;;  %2246 = vmatpush3.bf16.msra.mxu0 %v2495_v57 }
 0x1d8   : > { %v780_v14 = vsel %vm748_vm6, %v706_v7, %v764_v11 }
 0x1d9   : > { %v2193_v15 = vpop.f32.mrb[8].mxu0  ;;  %v778_v17 = vsel %vm746_vm7, %v698_v10, %v762_v12  ;;  %v792_v18 = vpack.c.bf16 %v780_v14, %v779_v13 }
 0x1da   : > { %v719_v19 = vadd.f32 %v2193_v15, %v3214_v46  ;;  %v710_v20 = vpop.f32.mrb[9].mxu0  ;;  %v791_v21 = vpack.c.bf16 %v778_v17, %v777_v16 }
 0x1db   : > { %v711_v22 = vadd.f32 %v3214_v46, %v710_v20  ;;  %v2194_v23 = vpop.f32.mrb[10].mxu0 }
 0x1dc   : > { %v767_v24 = vmul.f32 0.01, %v719_v19  ;;  %v722_v25 = vadd.f32 %v2194_v23, %v3214_v46  ;;  %v713_v26 = vpop.f32.mrb[11].mxu0  ;;  %2219 = vmatprep.mubr.bf16.mxu1 %v791_v21  ;;  %vm751_vm8 = vcmp.gt.f32.partialorder %v719_v19, 0.0 }
 0x1dd   : > { %v765_v27 = vmul.f32 0.01, %v711_v22  ;;  %v714_v28 = vadd.f32 %v3214_v46, %v713_v26  ;;  %2220 = vmatmul.mubr.bf16.gmra.mrb[4].mxu1 %v792_v18  ;;  %vm749_vm9 = vcmp.gt.f32.partialorder %v711_v22, 0.0 }
 0x1de   : > { %vm752_vm10 = vcmp.gt.f32.partialorder %v722_v25, 0.0  ;;  %v768_v29 = vmul.f32 0.01, %v722_v25  ;;  %v783_v31 = vsel %vm751_vm8, %v719_v19, %v767_v24 }
 0x1df   : > { %vm750_vm11 = vcmp.gt.f32.partialorder %v714_v28, 0.0  ;;  %v766_v30 = vmul.f32 0.01, %v714_v28  ;;  %v781_v34 = vsel %vm749_vm9, %v711_v22, %v765_v27 }
 0x1e0   : > { %v784_v32 = vsel %vm752_vm10, %v722_v25, %v768_v29 }
 0x1e1   : > { %v2197_v33 = vpop.f32.mrb[12].mxu0  ;;  %v782_v35 = vsel %vm750_vm11, %v714_v28, %v766_v30  ;;  %v794_v36 = vpack.c.bf16 %v784_v32, %v783_v31 }
 0x1e2   : > { %v735_v37 = vadd.f32 %v2197_v33, %v3214_v46  ;;  %v726_v38 = vpop.f32.mrb[13].mxu0  ;;  %v793_v39 = vpack.c.bf16 %v782_v35, %v781_v34 }
 0x1e3   : > { %v727_v40 = vadd.f32 %v3214_v46, %v726_v38  ;;  %v2198_v41 = vpop.f32.mrb[14].mxu0 }
 0x1e4   : > { %v771_v42 = vmul.f32 0.01, %v735_v37  ;;  %v738_v43 = vadd.f32 %v2198_v41, %v3214_v46  ;;  %v729_v44 = vpop.f32.mrb[15].mxu0  ;;  %2223 = vmatprep.mubr.bf16.mxu1 %v793_v39  ;;  %vm755_vm12 = vcmp.gt.f32.partialorder %v735_v37, 0.0 }
 0x1e5   : > { %v769_v45 = vmul.f32 0.01, %v727_v40  ;;  %v730_v47 = vadd.f32 %v3214_v46, %v729_v44  ;;  %2224 = vmatmul.mubr.bf16.gmra.mrb[8].mxu1 %v794_v36  ;;  %vm753_vm13 = vcmp.gt.f32.partialorder %v727_v40, 0.0  ;;  %v2496_v46 = vld [vmem:[#allocation10] sm:$0xff]  }
 0x1e6   : > { %vm756_vm14 = vcmp.gt.f32.partialorder %v738_v43, 0.0  ;;  %v772_v48 = vmul.f32 0.01, %v738_v43  ;;  %v787_v50 = vsel %vm755_vm12, %v735_v37, %v771_v42  ;;  %2263 = vmatprep.subr.bf16.mxu1 %v2496_v46 }
 0x1e7   : > { %vm754_vm15 = vcmp.gt.f32.partialorder %v730_v47, 0.0  ;;  %v770_v49 = vmul.f32 0.01, %v730_v47  ;;  %v785_v52 = vsel %vm753_vm13, %v727_v40, %v769_v45  ;;  %2264 = vmatpush3.bf16.msra.mxu1 %v2496_v46 }
 0x1e8   : > { %v788_v51 = vsel %vm756_vm14, %v738_v43, %v772_v48  ;;  %2265 = vmatprep.subr.bf16.mxu1 %v2497_v58 }
 0x1e9   : > { %v786_v53 = vsel %vm754_vm15, %v730_v47, %v770_v49  ;;  %v796_v54 = vpack.c.bf16 %v788_v51, %v787_v50 }
 0x1ea   : > { %v795_v55 = vpack.c.bf16 %v786_v53, %v785_v52 }
 0x1eb   : > { %2266 = vmatpush3.bf16.msra.mxu1 %v2497_v58 }
 0x1ec   : > { %2227 = vmatprep.mubr.bf16.mxu1 %v795_v55  ;;  %2267 = vmatprep.subr.bf16.mxu1 %v2498_v59 }
 0x1ed   : > { %2228 = vmatmul.mubr.bf16.gmra.mrb[12].mxu1 %v796_v54 }
 0x1ef   : > { %2268 = vmatpush3.bf16.msra.mxu1 %v2498_v59 }
 0x1f0   : > { %2269 = vmatprep.subr.bf16.mxu1 %v2499_v60 }
 0x1f3   : > { %2270 = vmatpush3.bf16.msra.mxu1 %v2499_v60 }
 0x1f4   : > { %2271 = vmatprep.subr.bf16.mxu1 %v2500_v61 }
 0x1f7   : > { %2272 = vmatpush3.bf16.msra.mxu1 %v2500_v61 }
 0x1f8   : > { %2273 = vmatprep.subr.bf16.mxu1 %v2501_v62 }
 0x1fb   : > { %2274 = vmatpush3.bf16.msra.mxu1 %v2501_v62 }
 0x2a8   : > { %v2217_v0 = vpop.f32.mrb[0].mxu1 }
 0x2a9   : > { %v911_v1 = vadd.f32 %v2217_v0, %v3235_v63  ;;  %v902_v2 = vpop.f32.mrb[1].mxu1 }
 0x2aa   : > { %v903_v3 = vadd.f32 %v3235_v63, %v902_v2  ;;  %v2218_v4 = vpop.f32.mrb[2].mxu1 }
 0x2ab   : > { %v983_v5 = vmul.f32 0.01, %v911_v1  ;;  %v914_v6 = vadd.f32 %v2218_v4, %v3235_v63  ;;  %v905_v7 = vpop.f32.mrb[3].mxu1  ;;  %vm967_vm0 = vcmp.gt.f32.partialorder %v911_v1, 0.0 }
 0x2ac   : > { %v981_v8 = vmul.f32 0.01, %v903_v3  ;;  %v906_v9 = vadd.f32 %v3235_v63, %v905_v7  ;;  %vm965_vm1 = vcmp.gt.f32.partialorder %v903_v3, 0.0 }
 0x2ad   : > { %vm968_vm2 = vcmp.gt.f32.partialorder %v914_v6, 0.0  ;;  %v984_v10 = vmul.f32 0.01, %v914_v6  ;;  %v999_v12 = vsel %vm967_vm0, %v911_v1, %v983_v5 }
 0x2ae   : > { %vm966_vm3 = vcmp.gt.f32.partialorder %v906_v9, 0.0  ;;  %v982_v11 = vmul.f32 0.01, %v906_v9  ;;  %v997_v16 = vsel %vm965_vm1, %v903_v3, %v981_v8 }
 0x2af   : > { %v1000_v13 = vsel %vm968_vm2, %v914_v6, %v984_v10  ;;  %v2503_v10 = vld [vmem:[#allocation10 + $0x38] sm:$0xff]  }
 0x2b0   : > { %v1014_v14 = vpack.c.bf16 %v1000_v13, %v999_v12  ;;  %v2221_v15 = vpop.f32.mrb[4].mxu1  ;;  %v998_v17 = vsel %vm966_vm3, %v906_v9, %v982_v11  ;;  %v2502_v9 = vld [vmem:[#allocation10 + $0x30] sm:$0xff]   ;;  %v2505_v11 = vld [vmem:[#allocation11 + $0x8] sm:$0xff]   ;;  %v2507_v13 = vld [vmem:[#allocation11 + $0x18] sm:$0xff]  }
 0x2b1   : > { %v927_v18 = vadd.f32 %v2221_v15, %v3235_v63  ;;  %v918_v19 = vpop.f32.mrb[5].mxu1  ;;  %v1013_v20 = vpack.c.bf16 %v998_v17, %v997_v16  ;;  %2275 = vmatprep.subr.bf16.mxu1 %v2502_v9  ;;  %v2506_v12 = vld [vmem:[#allocation11 + $0x10] sm:$0xff]   ;;  %v2509_v15 = vld [vmem:[#allocation11 + $0x28] sm:$0xff]   ;;  %v2028_v17 = vld [vmem:[%s3447_s29] ss:$0 sm:$0xff]  ;;  %s1859_s29 = sshll.u32 %s3311_s20, 4  ;;  %s3358_s29 = int_to_ptr.vmem [resolvable:$true] %s1859_s29 }
 0x2b2   : > { %v919_v21 = vadd.f32 %v3235_v63, %v918_v19  ;;  %v2222_v22 = vpop.f32.mrb[6].mxu1  ;;  %2276 = vmatpush3.bf16.msra.mxu1 %v2502_v9  ;;  %s2734_s15 = scalar_lea.vmem %s3358_s29, 2048 }
 0x2b3   : > { %v987_v23 = vmul.f32 0.01, %v927_v18  ;;  %v930_v24 = vadd.f32 %v2222_v22, %v3235_v63  ;;  %v921_v25 = vpop.f32.mrb[7].mxu1  ;;  %2247 = vmatprep.mubr.bf16.mxu0 %v1013_v20  ;;  %vm971_vm4 = vcmp.gt.f32.partialorder %v927_v18, 0.0  ;;  %2277 = vmatprep.subr.bf16.mxu1 %v2503_v10  ;;  %p2735_p6 = scmp.ne.s32.totalorder %s3358_s29, %s2734_s15 }
 0x2b4   : > { %v985_v26 = vmul.f32 0.01, %v919_v21  ;;  %v922_v27 = vadd.f32 %v3235_v63, %v921_v25  ;;  %2248 = vmatmul.mubr.bf16.vlgmr.msra.gmra.mrb[16].mxu0 %v1014_v14  ;;  %vm969_vm5 = vcmp.gt.f32.partialorder %v919_v21, 0.0  ;;  %v2508_v14 = vld [vmem:[#allocation11 + $0x20] sm:$0xff]  }
 0x2b5   : > { %vm972_vm6 = vcmp.gt.f32.partialorder %v930_v24, 0.0  ;;  %v988_v28 = vmul.f32 0.01, %v930_v24  ;;  %v1003_v30 = vsel %vm971_vm4, %v927_v18, %v987_v23  ;;  %p2736_p12 = pnand %p2735_p6, %p3452_p9 }
 0x2b6   : > { %vm970_vm7 = vcmp.gt.f32.partialorder %v922_v27, 0.0  ;;  %v986_v29 = vmul.f32 0.01, %v922_v27  ;;  %v1001_v33 = vsel %vm969_vm5, %v919_v21, %v985_v26  ;;  %2278 = vmatpush3.bf16.msra.mxu1 %v2503_v10 }
 0x2b7   : > { %v1004_v31 = vsel %vm972_vm6, %v930_v24, %v988_v28  ;;  %p2737_p1 = pneg %p2736_p12 }
 0x2b8   : > { %v2225_v32 = vpop.f32.mrb[8].mxu1  ;;  %v1002_v34 = vsel %vm970_vm7, %v922_v27, %v986_v29  ;;  %v1016_v35 = vpack.c.bf16 %v1004_v31, %v1003_v30 }
 0x2b9   : > { %v943_v36 = vadd.f32 %v2225_v32, %v3235_v63  ;;  %v934_v37 = vpop.f32.mrb[9].mxu1  ;;  %v1015_v38 = vpack.c.bf16 %v1002_v34, %v1001_v33 }
 0x2ba   : > { %v935_v39 = vadd.f32 %v3235_v63, %v934_v37  ;;  %v2226_v40 = vpop.f32.mrb[10].mxu1 }
 0x2bb   : > { %v991_v41 = vmul.f32 0.01, %v943_v36  ;;  %v946_v42 = vadd.f32 %v2226_v40, %v3235_v63  ;;  %v937_v43 = vpop.f32.mrb[11].mxu1  ;;  %2251 = vmatprep.mubr.bf16.mxu0 %v1015_v38  ;;  %vm975_vm8 = vcmp.gt.f32.partialorder %v943_v36, 0.0 }
 0x2bc   : > { %v989_v44 = vmul.f32 0.01, %v935_v39  ;;  %v938_v45 = vadd.f32 %v3235_v63, %v937_v43  ;;  %2252 = vmatmul.mubr.bf16.gmra.mrb[20].mxu0 %v1016_v35  ;;  %vm973_vm9 = vcmp.gt.f32.partialorder %v935_v39, 0.0 }
 0x2bd   : > { %vm976_vm10 = vcmp.gt.f32.partialorder %v946_v42, 0.0  ;;  %v992_v47 = vmul.f32 0.01, %v946_v42  ;;  %v1007_v49 = vsel %vm975_vm8, %v943_v36, %v991_v41 }
 0x2be   : > { %vm974_vm11 = vcmp.gt.f32.partialorder %v938_v45, 0.0  ;;  %v990_v48 = vmul.f32 0.01, %v938_v45  ;;  %v1005_v52 = vsel %vm973_vm9, %v935_v39, %v989_v44 }
 0x2bf   : > { %v1008_v50 = vsel %vm976_vm10, %v946_v42, %v992_v47 }
 0x2c0   : > { %v2229_v51 = vpop.f32.mrb[12].mxu1  ;;  %v1006_v53 = vsel %vm974_vm11, %v938_v45, %v990_v48  ;;  %v1018_v54 = vpack.c.bf16 %v1008_v50, %v1007_v49 }
 0x2c1   : > { %v959_v55 = vadd.f32 %v2229_v51, %v3235_v63  ;;  %v950_v56 = vpop.f32.mrb[13].mxu1  ;;  %v1017_v57 = vpack.c.bf16 %v1006_v53, %v1005_v52 }
 0x2c2   : > { %v951_v46 = vadd.f32 %v3235_v63, %v950_v56  ;;  %v2230_v58 = vpop.f32.mrb[14].mxu1 }
 0x2c3   : > { %v995_v59 = vmul.f32 0.01, %v959_v55  ;;  %v962_v60 = vadd.f32 %v2230_v58, %v3235_v63  ;;  %v953_v61 = vpop.f32.mrb[15].mxu1  ;;  %2255 = vmatprep.mubr.bf16.mxu0 %v1017_v57  ;;  %vm979_vm12 = vcmp.gt.f32.partialorder %v959_v55, 0.0  ;;  %v2511_v58 = vld [vmem:[#allocation11 + $0x38] sm:$0xff]  }
 0x2c4   : > { %v993_v62 = vmul.f32 0.01, %v951_v46  ;;  %v954_v0 = vadd.f32 %v3235_v63, %v953_v61  ;;  %2256 = vmatmul.mubr.bf16.gmra.mrb[24].mxu0 %v1018_v54  ;;  %vm977_vm13 = vcmp.gt.f32.partialorder %v951_v46, 0.0  ;;  %v2504_v63 = vld [vmem:[#allocation11] sm:$0xff]   ;;  %v2514_v61 = vld [vmem:[#allocation13 + $0x10] sm:$0xff]  }
 0x2c5   : > { %vm980_vm14 = vcmp.gt.f32.partialorder %v962_v60, 0.0  ;;  %v996_v1 = vmul.f32 0.01, %v962_v60  ;;  %v1011_v3 = vsel %vm979_vm12, %v959_v55, %v995_v59  ;;  %2295 = vmatprep.subr.bf16.mxu0 %v2504_v63  ;;  %v2512_v59 = vld [vmem:[#allocation13] sm:$0xff]  }
 0x2c6   : > { %vm978_vm15 = vcmp.gt.f32.partialorder %v954_v0, 0.0  ;;  %v994_v2 = vmul.f32 0.01, %v954_v0  ;;  %v1009_v5 = vsel %vm977_vm13, %v951_v46, %v993_v62  ;;  %2296 = vmatpush3.bf16.msra.mxu0 %v2504_v63  ;;  %v2510_v46 = vld [vmem:[#allocation11 + $0x30] sm:$0xff]   ;;  %2327 = vmatprep.subr.bf16.mxu1 %v2512_v59  ;;  %v2515_v62 = vld [vmem:[#allocation13 + $0x18] sm:$0xff]  }
 0x2c7   : > { %v1012_v4 = vsel %vm980_vm14, %v962_v60, %v996_v1  ;;  %2297 = vmatprep.subr.bf16.mxu0 %v2505_v11  ;;  %v2513_v60 = vld [vmem:[#allocation13 + $0x8] sm:$0xff]  }
 0x2c8   : > { %v1010_v6 = vsel %vm978_vm15, %v954_v0, %v994_v2  ;;  %v1020_v7 = vpack.c.bf16 %v1012_v4, %v1011_v3  ;;  %v2516_v0 = vld [vmem:[#allocation13 + $0x20] sm:$0xff]   ;;  %v2517_v1 = vld [vmem:[#allocation13 + $0x28] sm:$0xff]  }
 0x2c9   : > { %v1019_v8 = vpack.c.bf16 %v1010_v6, %v1009_v5  ;;  %v3259_v2 = vld [vmem:[%s3448_s12] ss:$0 sm:$0xff]  ;;  %s3356_s12 = scalar_lea.hbm %s3451_s14, %s2070_s17 }
 0x2ca   : > { %2298 = vmatpush3.bf16.msra.mxu0 %v2505_v11 }
 0x2cb   : > { %2259 = vmatprep.mubr.bf16.mxu0 %v1019_v8  ;;  %2299 = vmatprep.subr.bf16.mxu0 %v2506_v12 }
 0x2cc   : > { %2260 = vmatmul.mubr.bf16.gmra.mrb[28].mxu0 %v1020_v7 }
 0x2ce   : > { %2300 = vmatpush3.bf16.msra.mxu0 %v2506_v12 }
 0x2cf   : > { %2301 = vmatprep.subr.bf16.mxu0 %v2507_v13 }
 0x2d2   : > { %2302 = vmatpush3.bf16.msra.mxu0 %v2507_v13 }
 0x2d3   : > { %2303 = vmatprep.subr.bf16.mxu0 %v2508_v14 }
 0x2d6   : > { %2304 = vmatpush3.bf16.msra.mxu0 %v2508_v14 }
 0x2d7   : > { %2305 = vmatprep.subr.bf16.mxu0 %v2509_v15 }
 0x2da   : > { %2306 = vmatpush3.bf16.msra.mxu0 %v2509_v15 }
 0x2db   : > { %2307 = vmatprep.subr.bf16.mxu0 %v2510_v46 }
 0x2de   : > { %2308 = vmatpush3.bf16.msra.mxu0 %v2510_v46 }
 0x2df   : > { %2309 = vmatprep.subr.bf16.mxu0 %v2511_v58 }
 0x2e2   : > { %2310 = vmatpush3.bf16.msra.mxu0 %v2511_v58 }
 0x387   : > { %v2249_v16 = vpop.f32.mrb[16].mxu0 }
 0x388   : > { %v1126_v18 = vpop.f32.mrb[17].mxu0  ;;  %v1135_v20 = vadd.f32 %v2249_v16, %v2028_v17 }
 0x389   : > { %v2250_v19 = vpop.f32.mrb[18].mxu0  ;;  %v1127_v23 = vadd.f32 %v2028_v17, %v1126_v18 }
 0x38a   : > { %v1138_v21 = vadd.f32 %v2250_v19, %v2028_v17  ;;  %v1129_v22 = vpop.f32.mrb[19].mxu0 }
 0x38b   : > { %v1130_v24 = vadd.f32 %v2028_v17, %v1129_v22 }
 0x38c   : > { %v1190_v25 = vpack.c.bf16 %v1138_v21, %v1135_v20 }
 0x38d   : > { %v1189_v26 = vpack.c.bf16 %v1130_v24, %v1127_v23 }
 0x38f   : > { %v2253_v27 = vpop.f32.mrb[20].mxu0  ;;  %2279 = vmatprep.mubr.bf16.mxu1 %v1189_v26 }
 0x390   : > { %v1142_v28 = vpop.f32.mrb[21].mxu0  ;;  %2280 = vmatmul.mubr.bf16.vlgmr.msra.gmra.mrb[16].mxu1 %v1190_v25  ;;  %v1151_v30 = vadd.f32 %v2253_v27, %v2028_v17 }
 0x391   : > { %v2254_v29 = vpop.f32.mrb[22].mxu0  ;;  %v1143_v33 = vadd.f32 %v2028_v17, %v1142_v28  ;;  %2328 = vmatpush3.bf16.msra.mxu1 %v2512_v59 }
 0x392   : > { %v1154_v31 = vadd.f32 %v2254_v29, %v2028_v17  ;;  %v1145_v32 = vpop.f32.mrb[23].mxu0  ;;  %2329 = vmatprep.subr.bf16.mxu1 %v2513_v60 }
 0x393   : > { %v1146_v34 = vadd.f32 %v2028_v17, %v1145_v32 }
 0x394   : > { %v1192_v35 = vpack.c.bf16 %v1154_v31, %v1151_v30 }
 0x395   : > { %v1191_v36 = vpack.c.bf16 %v1146_v34, %v1143_v33  ;;  %2330 = vmatpush3.bf16.msra.mxu1 %v2513_v60 }
 0x396   : > { %2331 = vmatprep.subr.bf16.mxu1 %v2514_v61 }
 0x397   : > { %v2257_v37 = vpop.f32.mrb[24].mxu0  ;;  %2283 = vmatprep.mubr.bf16.mxu1 %v1191_v36 }
 0x398   : > { %v1158_v38 = vpop.f32.mrb[25].mxu0  ;;  %2284 = vmatmul.mubr.bf16.gmra.mrb[20].mxu1 %v1192_v35  ;;  %v1167_v40 = vadd.f32 %v2257_v37, %v2028_v17 }
 0x399   : > { %v2258_v39 = vpop.f32.mrb[26].mxu0  ;;  %v1159_v43 = vadd.f32 %v2028_v17, %v1158_v38  ;;  %2332 = vmatpush3.bf16.msra.mxu1 %v2514_v61 }
 0x39a   : > { %v1170_v41 = vadd.f32 %v2258_v39, %v2028_v17  ;;  %v1161_v42 = vpop.f32.mrb[27].mxu0  ;;  %2333 = vmatprep.subr.bf16.mxu1 %v2515_v62 }
 0x39b   : > { %v1162_v44 = vadd.f32 %v2028_v17, %v1161_v42 }
 0x39c   : > { %v1194_v45 = vpack.c.bf16 %v1170_v41, %v1167_v40 }
 0x39d   : > { %v1193_v47 = vpack.c.bf16 %v1162_v44, %v1159_v43  ;;  %2334 = vmatpush3.bf16.msra.mxu1 %v2515_v62 }
 0x39e   : > { %2335 = vmatprep.subr.bf16.mxu1 %v2516_v0 }
 0x39f   : > { %v2261_v48 = vpop.f32.mrb[28].mxu0  ;;  %2287 = vmatprep.mubr.bf16.mxu1 %v1193_v47 }
 0x3a0   : > { %v1174_v49 = vpop.f32.mrb[29].mxu0  ;;  %2288 = vmatmul.mubr.bf16.gmra.mrb[24].mxu1 %v1194_v45  ;;  %v1183_v51 = vadd.f32 %v2261_v48, %v2028_v17 }
 0x3a1   : > { %v2262_v50 = vpop.f32.mrb[30].mxu0  ;;  %v1175_v54 = vadd.f32 %v2028_v17, %v1174_v49  ;;  %2336 = vmatpush3.bf16.msra.mxu1 %v2516_v0 }
 0x3a2   : > { %v1186_v52 = vadd.f32 %v2262_v50, %v2028_v17  ;;  %v1177_v53 = vpop.f32.mrb[31].mxu0  ;;  %2337 = vmatprep.subr.bf16.mxu1 %v2517_v1 }
 0x3a3   : > { %v1178_v55 = vadd.f32 %v2028_v17, %v1177_v53 }
 0x3a4   : > { %v1196_v56 = vpack.c.bf16 %v1186_v52, %v1183_v51 }
 0x3a5   : > { %v1195_v57 = vpack.c.bf16 %v1178_v55, %v1175_v54  ;;  %2338 = vmatpush3.bf16.msra.mxu1 %v2517_v1 }
 0x3a7   : > { %2291 = vmatprep.mubr.bf16.mxu1 %v1195_v57 }
 0x3a8   : > { %2292 = vmatmul.mubr.bf16.gmra.mrb[28].mxu1 %v1196_v56 }
 0x463   : > { %v2281_v3 = vpop.f32.mrb[16].mxu1 }
 0x464   : > { %v1311_v4 = vadd.f32 %v2281_v3, %v3259_v2  ;;  %v1302_v5 = vpop.f32.mrb[17].mxu1 }
 0x465   : > { %v1303_v6 = vadd.f32 %v3259_v2, %v1302_v5  ;;  %v2282_v7 = vpop.f32.mrb[18].mxu1 }
 0x466   : > { %v1383_v8 = vmul.f32 0.01, %v1311_v4  ;;  %v1314_v9 = vadd.f32 %v2282_v7, %v3259_v2  ;;  %v1305_v10 = vpop.f32.mrb[19].mxu1  ;;  %vm1367_vm0 = vcmp.gt.f32.partialorder %v1311_v4, 0.0 }
 0x467   : > { %v1381_v63 = vmul.f32 0.01, %v1303_v6  ;;  %v1306_v11 = vadd.f32 %v3259_v2, %v1305_v10  ;;  %vm1365_vm1 = vcmp.gt.f32.partialorder %v1303_v6, 0.0 }
 0x468   : > { %vm1368_vm2 = vcmp.gt.f32.partialorder %v1314_v9, 0.0  ;;  %v1384_v12 = vmul.f32 0.01, %v1314_v9  ;;  %v1399_v14 = vsel %vm1367_vm0, %v1311_v4, %v1383_v8 }
 0x469   : > { %vm1366_vm3 = vcmp.gt.f32.partialorder %v1306_v11, 0.0  ;;  %v1382_v13 = vmul.f32 0.01, %v1306_v11  ;;  %v1397_v18 = vsel %vm1365_vm1, %v1303_v6, %v1381_v63 }
 0x46a   : > { %v1400_v15 = vsel %vm1368_vm2, %v1314_v9, %v1384_v12  ;;  %v2519_v12 = vld [vmem:[#allocation13 + $0x38] sm:$0xff]  }
 0x46b   : > { %v1414_v16 = vpack.c.bf16 %v1400_v15, %v1399_v14  ;;  %v2285_v17 = vpop.f32.mrb[20].mxu1  ;;  %v1398_v19 = vsel %vm1366_vm3, %v1306_v11, %v1382_v13  ;;  %v2518_v11 = vld [vmem:[#allocation13 + $0x30] sm:$0xff]  }
 0x46c   : > { %v1327_v20 = vadd.f32 %v2285_v17, %v3259_v2  ;;  %v1318_v21 = vpop.f32.mrb[21].mxu1  ;;  %v1413_v22 = vpack.c.bf16 %v1398_v19, %v1397_v18  ;;  %2339 = vmatprep.subr.bf16.mxu1 %v2518_v11 }
 0x46d   : > { %v1319_v23 = vadd.f32 %v3259_v2, %v1318_v21  ;;  %v2286_v24 = vpop.f32.mrb[22].mxu1  ;;  %2340 = vmatpush3.bf16.msra.mxu1 %v2518_v11 }
 0x46e   : > { %v1387_v25 = vmul.f32 0.01, %v1327_v20  ;;  %v1330_v26 = vadd.f32 %v2286_v24, %v3259_v2  ;;  %v1321_v27 = vpop.f32.mrb[23].mxu1  ;;  %2311 = vmatprep.mubr.bf16.mxu0 %v1413_v22  ;;  %vm1371_vm4 = vcmp.gt.f32.partialorder %v1327_v20, 0.0  ;;  %2341 = vmatprep.subr.bf16.mxu1 %v2519_v12 }
 0x46f   : > { %v1385_v28 = vmul.f32 0.01, %v1319_v23  ;;  %v1322_v29 = vadd.f32 %v3259_v2, %v1321_v27  ;;  %2312 = vmatmul.mubr.bf16.vlgmr.msra.gmra.mrb[32].mxu0 %v1414_v16  ;;  %vm1369_vm5 = vcmp.gt.f32.partialorder %v1319_v23, 0.0 }
 0x470   : > { %vm1372_vm6 = vcmp.gt.f32.partialorder %v1330_v26, 0.0  ;;  %v1388_v30 = vmul.f32 0.01, %v1330_v26  ;;  %v1403_v32 = vsel %vm1371_vm4, %v1327_v20, %v1387_v25 }
 0x471   : > { %vm1370_vm7 = vcmp.gt.f32.partialorder %v1322_v29, 0.0  ;;  %v1386_v31 = vmul.f32 0.01, %v1322_v29  ;;  %v1401_v35 = vsel %vm1369_vm5, %v1319_v23, %v1385_v28  ;;  %2342 = vmatpush3.bf16.msra.mxu1 %v2519_v12 }
 0x472   : > { %v1404_v33 = vsel %vm1372_vm6, %v1330_v26, %v1388_v30 }
 0x473   : > { %v2289_v34 = vpop.f32.mrb[24].mxu1  ;;  %v1402_v36 = vsel %vm1370_vm7, %v1322_v29, %v1386_v31  ;;  %v1416_v37 = vpack.c.bf16 %v1404_v33, %v1403_v32 }
 0x474   : > { %v1343_v38 = vadd.f32 %v2289_v34, %v3259_v2  ;;  %v1334_v39 = vpop.f32.mrb[25].mxu1  ;;  %v1415_v40 = vpack.c.bf16 %v1402_v36, %v1401_v35 }
 0x475   : > { %v1335_v41 = vadd.f32 %v3259_v2, %v1334_v39  ;;  %v2290_v42 = vpop.f32.mrb[26].mxu1 }
 0x476   : > { %v1391_v43 = vmul.f32 0.01, %v1343_v38  ;;  %v1346_v44 = vadd.f32 %v2290_v42, %v3259_v2  ;;  %v1337_v45 = vpop.f32.mrb[27].mxu1  ;;  %2315 = vmatprep.mubr.bf16.mxu0 %v1415_v40  ;;  %vm1375_vm8 = vcmp.gt.f32.partialorder %v1343_v38, 0.0 }
 0x477   : > { %v1389_v47 = vmul.f32 0.01, %v1335_v41  ;;  %v1338_v48 = vadd.f32 %v3259_v2, %v1337_v45  ;;  %2316 = vmatmul.mubr.bf16.gmra.mrb[36].mxu0 %v1416_v37  ;;  %vm1373_vm9 = vcmp.gt.f32.partialorder %v1335_v41, 0.0 }
 0x478   : > { %vm1376_vm10 = vcmp.gt.f32.partialorder %v1346_v44, 0.0  ;;  %v1392_v49 = vmul.f32 0.01, %v1346_v44  ;;  %v1407_v51 = vsel %vm1375_vm8, %v1343_v38, %v1391_v43 }
 0x479   : > { %vm1374_vm11 = vcmp.gt.f32.partialorder %v1338_v48, 0.0  ;;  %v1390_v50 = vmul.f32 0.01, %v1338_v48  ;;  %v1405_v54 = vsel %vm1373_vm9, %v1335_v41, %v1389_v47 }
 0x47a   : > { %v1408_v52 = vsel %vm1376_vm10, %v1346_v44, %v1392_v49 }
 0x47b   : > { %v2293_v53 = vpop.f32.mrb[28].mxu1  ;;  %v1406_v55 = vsel %vm1374_vm11, %v1338_v48, %v1390_v50  ;;  %v1418_v56 = vpack.c.bf16 %v1408_v52, %v1407_v51 }
 0x47c   : > { %v1359_v57 = vadd.f32 %v2293_v53, %v3259_v2  ;;  %v1350_v46 = vpop.f32.mrb[29].mxu1  ;;  %v1417_v58 = vpack.c.bf16 %v1406_v55, %v1405_v54 }
 0x47d   : > { %v1351_v59 = vadd.f32 %v3259_v2, %v1350_v46  ;;  %v2294_v60 = vpop.f32.mrb[30].mxu1 }
 0x47e   : > { %v1395_v61 = vmul.f32 0.01, %v1359_v57  ;;  %v1362_v62 = vadd.f32 %v2294_v60, %v3259_v2  ;;  %v1353_v0 = vpop.f32.mrb[31].mxu1  ;;  %2319 = vmatprep.mubr.bf16.mxu0 %v1417_v58  ;;  %vm1379_vm12 = vcmp.gt.f32.partialorder %v1359_v57, 0.0 }
 0x47f   : > { %v1393_v1 = vmul.f32 0.01, %v1351_v59  ;;  %v1354_v3 = vadd.f32 %v3259_v2, %v1353_v0  ;;  %2320 = vmatmul.mubr.bf16.gmra.mrb[40].mxu0 %v1418_v56  ;;  %vm1377_vm13 = vcmp.gt.f32.partialorder %v1351_v59, 0.0  ;;  %v3280_v2 = vld [vmem:[%s3449_s22] ss:$0 sm:$0xff]  ;;  %s2825_s22 = smov [#allocation14]  }
 0x480   : > { %vm1380_vm14 = vcmp.gt.f32.partialorder %v1362_v62, 0.0  ;;  %v1396_v4 = vmul.f32 0.01, %v1362_v62  ;;  %v1411_v6 = vsel %vm1379_vm12, %v1359_v57, %v1395_v61  ;;  %s2738_s23 = sshll.u32 %s2825_s22, 4  ;;  %s2739_s23 = int_to_ptr.vmem [resolvable:$false] %s2738_s23 }
 0x481   : > { %vm1378_vm15 = vcmp.gt.f32.partialorder %v1354_v3, 0.0  ;;  %v1394_v5 = vmul.f32 0.01, %v1354_v3  ;;  %v1409_v8 = vsel %vm1377_vm13, %v1351_v59, %v1393_v1  ;;  %s2740_s10 = scalar_lea.vmem %s2739_s23, 4096  ;;  %p2741_p13 = scmp.lt.s32.totalorder %s3358_s29, %s2739_s23 }
 0x482   : > { %v1412_v7 = vsel %vm1380_vm14, %v1362_v62, %v1396_v4  ;;  %p2742_p0 = scmp.lt.s32.totalorder %s2740_s10, %s2734_s15 }
 0x483   : > { %v1410_v9 = vsel %vm1378_vm15, %v1354_v3, %v1394_v5  ;;  %v1420_v10 = vpack.c.bf16 %v1412_v7, %v1411_v6 }
 0x484   : > { %v1419_v63 = vpack.c.bf16 %v1410_v9, %v1409_v8  ;;  %p2743_p2 = por %p2742_p0, %p2741_p13 }
 0x486   : > { %2323 = vmatprep.mubr.bf16.mxu0 %v1419_v63  ;;  %p2744_p8 = pnand %p2743_p2, %p2737_p1 }
 0x487   : > { %2324 = vmatmul.mubr.bf16.gmra.mrb[44].mxu0 %v1420_v10 }
 0x542   : > { %v2313_v13 = vpop.f32.mrb[32].mxu0 }
 0x543   : > { %v1535_v14 = vadd.f32 %v2313_v13, %v3280_v2  ;;  %v1526_v15 = vpop.f32.mrb[33].mxu0 }
 0x544   : > { %v1527_v16 = vadd.f32 %v3280_v2, %v1526_v15  ;;  %v2314_v17 = vpop.f32.mrb[34].mxu0 }
 0x545   : > { %v1607_v18 = vmul.f32 0.01, %v1535_v14  ;;  %v1538_v19 = vadd.f32 %v2314_v17, %v3280_v2  ;;  %v1529_v20 = vpop.f32.mrb[35].mxu0  ;;  %vm1591_vm0 = vcmp.gt.f32.partialorder %v1535_v14, 0.0 }
 0x546   : > { %v1605_v21 = vmul.f32 0.01, %v1527_v16  ;;  %v1530_v22 = vadd.f32 %v3280_v2, %v1529_v20  ;;  %vm1589_vm1 = vcmp.gt.f32.partialorder %v1527_v16, 0.0 }
 0x547   : > { %vm1592_vm2 = vcmp.gt.f32.partialorder %v1538_v19, 0.0  ;;  %v1608_v23 = vmul.f32 0.01, %v1538_v19  ;;  %v1623_v25 = vsel %vm1591_vm0, %v1535_v14, %v1607_v18 }
 0x548   : > { %vm1590_vm3 = vcmp.gt.f32.partialorder %v1530_v22, 0.0  ;;  %v1606_v24 = vmul.f32 0.01, %v1530_v22  ;;  %v1621_v29 = vsel %vm1589_vm1, %v1527_v16, %v1605_v21 }
 0x549   : > { %v1624_v26 = vsel %vm1592_vm2, %v1538_v19, %v1608_v23 }
 0x54a   : > { %v1638_v27 = vpack.c.bf16 %v1624_v26, %v1623_v25  ;;  %v2317_v28 = vpop.f32.mrb[36].mxu0  ;;  %v1622_v30 = vsel %vm1590_vm3, %v1530_v22, %v1606_v24 }
 0x54b   : > { %v1551_v31 = vadd.f32 %v2317_v28, %v3280_v2  ;;  %v1542_v32 = vpop.f32.mrb[37].mxu0  ;;  %v1637_v33 = vpack.c.bf16 %v1622_v30, %v1621_v29 }
 0x54c   : > { %v1543_v34 = vadd.f32 %v3280_v2, %v1542_v32  ;;  %v2318_v35 = vpop.f32.mrb[38].mxu0 }
 0x54d   : > { %v1611_v36 = vmul.f32 0.01, %v1551_v31  ;;  %v1554_v37 = vadd.f32 %v2318_v35, %v3280_v2  ;;  %v1545_v38 = vpop.f32.mrb[39].mxu0  ;;  %2343 = vmatprep.mubr.bf16.mxu1 %v1637_v33  ;;  %vm1595_vm4 = vcmp.gt.f32.partialorder %v1551_v31, 0.0 }
 0x54e   : > { %v1609_v39 = vmul.f32 0.01, %v1543_v34  ;;  %v1546_v40 = vadd.f32 %v3280_v2, %v1545_v38  ;;  %2344 = vmatmul.mubr.bf16.vlgmr.msra.gmra.mrb[32].mxu1 %v1638_v27  ;;  %vm1593_vm5 = vcmp.gt.f32.partialorder %v1543_v34, 0.0  ;;  %v2520_v27 = vld [vmem:[%s3177_s30 + $0x10] sm:$0xff] }
 0x54f   : > { %vm1596_vm6 = vcmp.gt.f32.partialorder %v1554_v37, 0.0  ;;  %v1612_v41 = vmul.f32 0.01, %v1554_v37  ;;  %v1627_v43 = vsel %vm1595_vm4, %v1551_v31, %v1611_v36  ;;  %v2521_v31 = vld [vmem:[%s3177_s30] sm:$0xff]  ;;  %v2523_v36 = vld [vmem:[%s3177_s30 + $0x8] sm:$0xff] }
 0x550   : > { %vm1594_vm7 = vcmp.gt.f32.partialorder %v1546_v40, 0.0  ;;  %v1610_v42 = vmul.f32 0.01, %v1546_v40  ;;  %v1625_v47 = vsel %vm1593_vm5, %v1543_v34, %v1609_v39  ;;  %v2522_v34 = vld [vmem:[%s3177_s30 + $0x18] sm:$0xff] }
 0x551   : > { %v1628_v44 = vsel %vm1596_vm6, %v1554_v37, %v1612_v41 }
 0x552   : > { %v2321_v45 = vpop.f32.mrb[40].mxu0  ;;  %v1626_v48 = vsel %vm1594_vm7, %v1546_v40, %v1610_v42  ;;  %v1640_v49 = vpack.c.bf16 %v1628_v44, %v1627_v43  ;;  %v2524_v43 = vld [vmem:[%s3177_s30 + $0x30] sm:$0xff] }
 0x553   : > { %v1567_v50 = vadd.f32 %v2321_v45, %v3280_v2  ;;  %v1558_v51 = vpop.f32.mrb[41].mxu0  ;;  %v1639_v52 = vpack.c.bf16 %v1626_v48, %v1625_v47  ;;  %v2525_v48 = vld [vmem:[%s3177_s30 + $0x20] sm:$0xff] }
 0x554   : > { %v1559_v53 = vadd.f32 %v3280_v2, %v1558_v51  ;;  %v2322_v54 = vpop.f32.mrb[42].mxu0  ;;  %v2526_v51 = vld [vmem:[%s3177_s30 + $0x38] sm:$0xff] }
 0x555   : > { %v1615_v55 = vmul.f32 0.01, %v1567_v50  ;;  %v1570_v56 = vadd.f32 %v2322_v54, %v3280_v2  ;;  %v1561_v57 = vpop.f32.mrb[43].mxu0  ;;  %2347 = vmatprep.mubr.bf16.mxu1 %v1639_v52  ;;  %vm1599_vm8 = vcmp.gt.f32.partialorder %v1567_v50, 0.0 }
 0x556   : > { %v1613_v46 = vmul.f32 0.01, %v1559_v53  ;;  %v1562_v58 = vadd.f32 %v3280_v2, %v1561_v57  ;;  %2348 = vmatmul.mubr.bf16.gmra.mrb[36].mxu1 %v1640_v49  ;;  %vm1597_vm9 = vcmp.gt.f32.partialorder %v1559_v53, 0.0 }
 0x557   : > { %vm1600_vm10 = vcmp.gt.f32.partialorder %v1570_v56, 0.0  ;;  %v1616_v59 = vmul.f32 0.01, %v1570_v56  ;;  %v1631_v61 = vsel %vm1599_vm8, %v1567_v50, %v1615_v55 }
 0x558   : > { %vm1598_vm11 = vcmp.gt.f32.partialorder %v1562_v58, 0.0  ;;  %v1614_v60 = vmul.f32 0.01, %v1562_v58  ;;  %v1629_v1 = vsel %vm1597_vm9, %v1559_v53, %v1613_v46  ;;  %v2527_v53 = vld [vmem:[%s3177_s30 + $0x28] sm:$0xff] }
 0x559   : > { %v1632_v62 = vsel %vm1600_vm10, %v1570_v56, %v1616_v59  ;;  %v2528_v59 = vld [vmem:[%s3177_s30 + $0x50] sm:$0xff] }
 0x55a   : > { %v2325_v0 = vpop.f32.mrb[44].mxu0  ;;  %v1630_v3 = vsel %vm1598_vm11, %v1562_v58, %v1614_v60  ;;  %v1642_v4 = vpack.c.bf16 %v1632_v62, %v1631_v61 }
 0x55b   : > { %v1583_v5 = vadd.f32 %v2325_v0, %v3280_v2  ;;  %v1574_v6 = vpop.f32.mrb[45].mxu0  ;;  %v1641_v7 = vpack.c.bf16 %v1630_v3, %v1629_v1  ;;  %v2529_v0 = vld [vmem:[%s3177_s30 + $0x40] sm:$0xff] }
 0x55c   : > { %v1575_v8 = vadd.f32 %v3280_v2, %v1574_v6  ;;  %v2326_v9 = vpop.f32.mrb[46].mxu0  ;;  %v2531_v6 = vld [vmem:[%s3177_s30 + $0x48] sm:$0xff] }
 0x55d   : > { %v1619_v10 = vmul.f32 0.01, %v1583_v5  ;;  %v1586_v63 = vadd.f32 %v2326_v9, %v3280_v2  ;;  %v1577_v11 = vpop.f32.mrb[47].mxu0  ;;  %2351 = vmatprep.mubr.bf16.mxu1 %v1641_v7  ;;  %vm1603_vm12 = vcmp.gt.f32.partialorder %v1583_v5, 0.0 }
 0x55e   : > { %v1617_v12 = vmul.f32 0.01, %v1575_v8  ;;  %v1578_v13 = vadd.f32 %v3280_v2, %v1577_v11  ;;  %2352 = vmatmul.mubr.bf16.gmra.mrb[40].mxu1 %v1642_v4  ;;  %vm1601_vm13 = vcmp.gt.f32.partialorder %v1575_v8, 0.0  ;;  %v3301_v2 = vld [vmem:[%s3450_s18] ss:$0 sm:$0xff]  ;;  %v2530_v4 = vld [vmem:[%s3177_s30 + $0x58] sm:$0xff] }
 0x55f   : > { %vm1604_vm14 = vcmp.gt.f32.partialorder %v1586_v63, 0.0  ;;  %v1620_v14 = vmul.f32 0.01, %v1586_v63  ;;  %v1635_v16 = vsel %vm1603_vm12, %v1583_v5, %v1619_v10 }
 0x560   : > { %vm1602_vm15 = vcmp.gt.f32.partialorder %v1578_v13, 0.0  ;;  %v1618_v15 = vmul.f32 0.01, %v1578_v13  ;;  %v1633_v18 = vsel %vm1601_vm13, %v1575_v8, %v1617_v12  ;;  %v2532_v12 = vld [vmem:[%s3177_s30 + $0x70] sm:$0xff] }
 0x561   : > { %v1636_v17 = vsel %vm1604_vm14, %v1586_v63, %v1620_v14 }
 0x562   : > { %v1634_v19 = vsel %vm1602_vm15, %v1578_v13, %v1618_v15  ;;  %v1644_v20 = vpack.c.bf16 %v1636_v17, %v1635_v16  ;;  %v2533_v16 = vld [vmem:[%s3177_s30 + $0x60] sm:$0xff] }
 0x563   : > { %v1643_v21 = vpack.c.bf16 %v1634_v19, %v1633_v18  ;;  %v2534_v19 = vld [vmem:[%s3177_s30 + $0x78] sm:$0xff] }
 0x565   : > { %2355 = vmatprep.mubr.bf16.mxu1 %v1643_v21  ;;  %v2535_v21 = vld [vmem:[%s3177_s30 + $0x68] sm:$0xff] }
 0x566   : > { %2356 = vmatmul.mubr.bf16.gmra.mrb[44].mxu1 %v1644_v20 }
 0x621   : > { %v2345_v22 = vpop.f32.mrb[32].mxu1 }
 0x622   : > { %v1759_v23 = vadd.f32 %v2345_v22, %v3301_v2  ;;  %v1750_v24 = vpop.f32.mrb[33].mxu1 }
 0x623   : > { %v1751_v25 = vadd.f32 %v3301_v2, %v1750_v24  ;;  %v2346_v26 = vpop.f32.mrb[34].mxu1 }
 0x624   : > { %v1815_v28 = vadd.f32 %v2520_v27, %v1759_v23  ;;  %v1762_v29 = vadd.f32 %v2346_v26, %v3301_v2  ;;  %v1753_v30 = vpop.f32.mrb[35].mxu1 }
 0x625   : > { %v1813_v32 = vadd.f32 %v2521_v31, %v1751_v25  ;;  %v1754_v33 = vadd.f32 %v3301_v2, %v1753_v30 }
 0x626   : > { %1831 = vst [vmem:[%s3311_s20 + $0x10] sm:$0xff] %v1815_v28  ;;  %v1816_v35 = vadd.f32 %v2522_v34, %v1762_v29 }
 0x627   : > { %1829 = vst [vmem:[%s3311_s20] sm:$0xff] %v1813_v32  ;;  %v1814_v37 = vadd.f32 %v2523_v36, %v1754_v33 }
 0x628   : > { %1832 = vst [vmem:[%s3311_s20 + $0x18] sm:$0xff] %v1816_v35 }
 0x629   : > { %1830 = vst [vmem:[%s3311_s20 + $0x8] sm:$0xff] %v1814_v37  ;;  %v2349_v38 = vpop.f32.mrb[36].mxu1 }
 0x62a   : > { %v1775_v39 = vadd.f32 %v2349_v38, %v3301_v2  ;;  %v1766_v40 = vpop.f32.mrb[37].mxu1 }
 0x62b   : > { %v1767_v41 = vadd.f32 %v3301_v2, %v1766_v40  ;;  %v2350_v42 = vpop.f32.mrb[38].mxu1 }
 0x62c   : > { %v1819_v44 = vadd.f32 %v2524_v43, %v1775_v39  ;;  %v1778_v45 = vadd.f32 %v2350_v42, %v3301_v2  ;;  %v1769_v47 = vpop.f32.mrb[39].mxu1 }
 0x62d   : > { %v1817_v49 = vadd.f32 %v2525_v48, %v1767_v41  ;;  %v1770_v50 = vadd.f32 %v3301_v2, %v1769_v47 }
 0x62e   : > { %1835 = vst [vmem:[%s3311_s20 + $0x30] sm:$0xff] %v1819_v44  ;;  %v1820_v52 = vadd.f32 %v2526_v51, %v1778_v45 }
 0x62f   : > { %1833 = vst [vmem:[%s3311_s20 + $0x20] sm:$0xff] %v1817_v49  ;;  %v1818_v54 = vadd.f32 %v2527_v53, %v1770_v50 }
 0x630   : > { %1836 = vst [vmem:[%s3311_s20 + $0x38] sm:$0xff] %v1820_v52 }
 0x631   : > { %1834 = vst [vmem:[%s3311_s20 + $0x28] sm:$0xff] %v1818_v54  ;;  %v2353_v55 = vpop.f32.mrb[40].mxu1 }
 0x632   : > { %v1791_v56 = vadd.f32 %v2353_v55, %v3301_v2  ;;  %v1782_v57 = vpop.f32.mrb[41].mxu1 }
 0x633   : > { %v1783_v46 = vadd.f32 %v3301_v2, %v1782_v57  ;;  %v2354_v58 = vpop.f32.mrb[42].mxu1 }
 0x634   : > { %v1823_v60 = vadd.f32 %v2528_v59, %v1791_v56  ;;  %v1794_v61 = vadd.f32 %v2354_v58, %v3301_v2  ;;  %v1785_v62 = vpop.f32.mrb[43].mxu1 }
 0x635   : > { %v1821_v1 = vadd.f32 %v2529_v0, %v1783_v46  ;;  %v1786_v3 = vadd.f32 %v3301_v2, %v1785_v62 }
 0x636   : > { %1839 = vst [vmem:[%s3311_s20 + $0x50] sm:$0xff] %v1823_v60  ;;  %v1824_v5 = vadd.f32 %v2530_v4, %v1794_v61 }
 0x637   : > { %1837 = vst [vmem:[%s3311_s20 + $0x40] sm:$0xff] %v1821_v1  ;;  %v1822_v7 = vadd.f32 %v2531_v6, %v1786_v3 }
 0x638   : > { %1840 = vst [vmem:[%s3311_s20 + $0x58] sm:$0xff] %v1824_v5 }
 0x639   : > { %1838 = vst [vmem:[%s3311_s20 + $0x48] sm:$0xff] %v1822_v7  ;;  %v2357_v8 = vpop.f32.mrb[44].mxu1 }
 0x63a   : > { %v1807_v9 = vadd.f32 %v2357_v8, %v3301_v2  ;;  %v1798_v10 = vpop.f32.mrb[45].mxu1 }
 0x63b   : > { %v1799_v63 = vadd.f32 %v3301_v2, %v1798_v10  ;;  %v2358_v11 = vpop.f32.mrb[46].mxu1 }
 0x63c   : > { %v1827_v13 = vadd.f32 %v2532_v12, %v1807_v9  ;;  %v1810_v14 = vadd.f32 %v2358_v11, %v3301_v2  ;;  %v1801_v15 = vpop.f32.mrb[47].mxu1 }
 0x63d   : > { %v1825_v17 = vadd.f32 %v2533_v16, %v1799_v63  ;;  %v1802_v18 = vadd.f32 %v3301_v2, %v1801_v15 }
 0x63e   : > { %1843 = vst [vmem:[%s3311_s20 + $0x70] sm:$0xff] %v1827_v13  ;;  %v1828_v20 = vadd.f32 %v2534_v19, %v1810_v14 }
 0x63f   : > { %1841 = vst [vmem:[%s3311_s20 + $0x60] sm:$0xff] %v1825_v17  ;;  %v1826_v22 = vadd.f32 %v2535_v21, %v1802_v18 }
 0x640   : > { %1844 = vst [vmem:[%s3311_s20 + $0x78] sm:$0xff] %v1828_v20 }
 0x641   : > { %1842 = vst [vmem:[%s3311_s20 + $0x68] sm:$0xff] %v1826_v22 }
 0x642   : > { %2747 = shalt.err (!%p2744_p8)
}
 0x643   : > { %s2748_s30 = scalar_lea.hbm %s3356_s12, 2048  ;;  %s2752_s17 = scalar_lea.hbm %s3451_s14, 4096 }
 0x644   : > { %p2749_p4 = scmp.ne.s32.totalorder %s3356_s12, %s2748_s30  ;;  %p2753_p3 = scmp.lt.u32.totalorder %s3356_s12, %s3451_s14 }
 0x645   : > { %p2754_p5 = scmp.lt.u32.totalorder %s2752_s17, %s2748_s30  ;;  %p2756_p6 = scmp.lt.u32.totalorder %s2748_s30, %s3356_s12 }
 0x646   : > { %p2750_p10 = pnand %p2749_p4, %p3452_p9 }
 0x647   : > { %p2755_p7 = por %p2754_p5, %p2753_p3 }
 0x648   : > { %p2751_p11 = pneg %p2750_p10 }
 0x649   : > { %p2757_p12 = por %p2756_p6, %p2755_p7 }
 0x64b   : > { %p2758_p1 = pnand %p2757_p12, %p2751_p11 }
 0x64d   : > { %2761 = shalt.err (!%p2758_p1)
}
 0x64e   : > { %s2826_s15 = smov 128   ;;  %s2827_s22 = smov 8  }
 0x64f   : > { %2385 = dma.vmem_to_hbm [thread:$0]  (%p3452_p9), %s3358_s29, 2048, %s3356_s12, %s1846_s13, %s2826_s15, %s2826_s15, %s2827_s22  }
 0x650 PF: > { %s1874_s23 = sand.u32 1, %s2800_s25   ;;  %p3453_p13 = scmp.ne.s32.totalorder %s3438_s24, 0 }
 0x651   : > { %p3454_p0 = scmp.ge.s32.totalorder %s2812_s28, 2  ;;  %s1875_s10 = scalar_lea.sflag [#allocation4], %s1874_s23 }
 0x653   : > { %p2411_p2 = pnand %p3454_p0, %p3453_p13 }
 0x655   : > { %2795 = dma.done.wait (!%p2411_p2), %s1875_s10, 2048  }
 0x656   : > { %2797 = vsyncadd (!%p2411_p2), %s1875_s10, 4294965248  ;;  %p29_p8 = scmp.ge.s32.totalorder %s3092_s16, 4   ;;  %s3455_s25 = smov %s2804_s26 }
 0x657   : > { %s3456_s26 = smov %s2808_s27  ;;  %s3457_s27 = smov %s3103_s8 }
 0x658   : > { %s3458_s28 = smov %s3092_s16  ;;  %31 = sbr.rel (!%p29_p8) target bundleno = 15 (0xf), region = 141 }
 0x65f   :  { %1880 = vsyncpa [#allocation3], 1 }
 0x660   :  { %1882 = vsyncpa [#allocation3 + $0x1], 1 }
 0x661   :  { %1883 = vsyncpa [#allocation6], 1 }
 0x662   :  { %1884 = vsyncpa [#allocation9], 1 }
 0x663   :  { %1885 = vsyncpa [#allocation12], 1 }
 0x664   :  { %1886 = vsyncpa [#allocation4], 1 }
 0x665   :  { %1888 = vsyncpa [#allocation4 + $0x1], 1 }

</bundles_post_ra>
